<compile_context>
chip_gen: v7x
topology: tpu7x:2x2x1
jax: 0.10.0
libtpu: 0.0.40
codegen_flags: <defaults>
</compile_context>

<pallas_src>
import jax
import jax.numpy as jnp
from jax.experimental import pallas as pl
from jax.experimental.pallas import tpu as pltpu

HIDDEN = 512
LANE = 128


def _round_up(x, m):
    return ((x + m - 1) // m) * m


def dqn_kernel(x_ref,
               w1_ref, b1_ref,
               w2_ref, b2_ref,
               w3_ref, b3_ref,
               w4_ref, b4_ref,
               o_ref):
    # fc1 + relu (+ dropout == identity at eval). bf16 x bf16 -> f32 MXU path.
    h = jnp.dot(x_ref[...].astype(jnp.bfloat16), w1_ref[...],
                preferred_element_type=jnp.float32) + b1_ref[...]
    h = jnp.maximum(h, 0.0)
    # fc2 + relu
    h = jnp.dot(h.astype(jnp.bfloat16), w2_ref[...],
                preferred_element_type=jnp.float32) + b2_ref[...]
    h = jnp.maximum(h, 0.0)
    # fc3 + relu
    h = jnp.dot(h.astype(jnp.bfloat16), w3_ref[...],
                preferred_element_type=jnp.float32) + b3_ref[...]
    h = jnp.maximum(h, 0.0)
    # fc4 (no activation)
    o_ref[...] = (jnp.dot(h.astype(jnp.bfloat16), w4_ref[...],
                          preferred_element_type=jnp.float32) + b4_ref[...]
                  ).astype(o_ref.dtype)


def prepare_params(params, weight_dtype=jnp.bfloat16):
    """One-time conversion of PyTorch-convention params for the kernel.

    Transposes (out, in) -> (in, out), zero-pads the input-feature dim of w1
    and the action dim of w4/b4 to multiples of 128 lanes, and casts weights
    to bf16. Biases stay f32 with shape (1, out). Call this ONCE at init, not
    per forward call.
    """
    in_dim = params["w1"].shape[1]
    nb_actions = params["w4"].shape[0]
    f_pad = _round_up(in_dim, LANE)
    a_pad = _round_up(nb_actions, LANE)

    def prep_w(w, in_pad, out_pad):
        w = w.T.astype(weight_dtype)              # (in, out)
        return jnp.pad(w, ((0, in_pad - w.shape[0]), (0, out_pad - w.shape[1])))

    def prep_b(b, out_pad):
        b = b.astype(jnp.float32)[None, :]        # (1, out)
        return jnp.pad(b, ((0, 0), (0, out_pad - b.shape[1])))

    return {
        "w1": prep_w(params["w1"], f_pad, HIDDEN), "b1": prep_b(params["b1"], HIDDEN),
        "w2": prep_w(params["w2"], HIDDEN, HIDDEN), "b2": prep_b(params["b2"], HIDDEN),
        "w3": prep_w(params["w3"], HIDDEN, HIDDEN), "b3": prep_b(params["b3"], HIDDEN),
        "w4": prep_w(params["w4"], HIDDEN, a_pad), "b4": prep_b(params["b4"], a_pad),
    }


def dqn_forward(x, p, nb_actions):
    """x: (B, input_shape) float32. p: output of prepare_params()."""
    B, F = x.shape
    f_pad = p["w1"].shape[0]
    a_pad = p["w4"].shape[1]

    # Batch tile: 128 rows per MXU pass for real batches; tiny batches collapse
    # to a single 8-row tile (sublane-aligned) with grid size 1.
    tb = min(128, _round_up(B, 8))
    b_pad = _round_up(B, tb)
    n_tiles = b_pad // tb

    # Cheap per-call pad of activations only (weights already padded once).
    x_p = jnp.pad(x.astype(jnp.float32), ((0, b_pad - B), (0, f_pad - F)))

    def resident(shape):
        # Same block every grid step -> stays VMEM-resident (no re-DMA).
        return pl.BlockSpec(shape, lambda i: (0, 0))

    out = pl.pallas_call(
        dqn_kernel,
        out_shape=jax.ShapeDtypeStruct((b_pad, a_pad), jnp.float32),
        grid=(n_tiles,),
        in_specs=[
            pl.BlockSpec((tb, f_pad), lambda i: (i, 0)),
            resident(p["w1"].shape), resident(p["b1"].shape),
            resident(p["w2"].shape), resident(p["b2"].shape),
            resident(p["w3"].shape), resident(p["b3"].shape),
            resident(p["w4"].shape), resident(p["b4"].shape),
        ],
        out_specs=pl.BlockSpec((tb, a_pad), lambda i: (i, 0)),
        compiler_params=pltpu.CompilerParams(
            dimension_semantics=("parallel",),
            vmem_limit_bytes=16 << 20),
    )(x_p,
      p["w1"], p["b1"], p["w2"], p["b2"],
      p["w3"], p["b3"], p["w4"], p["b4"])

    return out[:B, :nb_actions]


def init_params(key, input_shape, nb_actions, hidden=HIDDEN):
    """Deterministic synthetic parameters in PyTorch nn.Linear convention
    (weight shape = (out_features, in_features))."""
    ks = jax.random.split(key, 8)

    def lin(kw, kb, fan_in, fan_out):
        bound = 1.0 / jnp.sqrt(fan_in)
        w = jax.random.uniform(kw, (fan_out, fan_in), jnp.float32, -bound, bound)
        b = jax.random.uniform(kb, (fan_out,), jnp.float32, -bound, bound)
        return w, b

    w1, b1 = lin(ks[0], ks[1], input_shape, hidden)
    w2, b2 = lin(ks[2], ks[3], hidden, hidden)
    w3, b3 = lin(ks[4], ks[5], hidden, hidden)
    w4, b4 = lin(ks[6], ks[7], hidden, nb_actions)
    return {"w1": w1, "b1": b1, "w2": w2, "b2": b2,
            "w3": w3, "b3": b3, "w4": w4, "b4": b4}


def dqn_forward_ref(x, params):
    """Pure-JAX reference mirroring the PyTorch forward (eval mode) with the
    same bf16 weight/activation quantization the kernel applies."""
    def layer(h, w, b, relu):
        y = jnp.dot(h.astype(jnp.bfloat16), w.T.astype(jnp.bfloat16),
                    preferred_element_type=jnp.float32) + b.astype(jnp.float32)
        return jnp.maximum(y, 0.0) if relu else y

    h = layer(x, params["w1"], params["b1"], True)
    h = layer(h, params["w2"], params["b2"], True)
    h = layer(h, params["w3"], params["b3"], True)
    return layer(h, params["w4"], params["b4"], False)


if __name__ == "__main__":
    key = jax.random.PRNGKey(0)
    k_x, k_p = jax.random.split(key)

    batch = 2
    input_shape = 32      # observation vector length fed to the DQN
    nb_actions = 8

    x = jax.random.normal(k_x, (batch, input_shape), jnp.float32)
    params = init_params(k_p, input_shape, nb_actions)

    # One-time weight prep (transpose + pad + bf16), kept across calls.
    prepped = prepare_params(params)

    out = dqn_forward(x, prepped, nb_actions)
    out = jax.block_until_ready(out)

    ref = dqn_forward_ref(x, params)
    assert out.shape == (batch, nb_actions)
    assert jnp.allclose(out, ref, atol=1e-3, rtol=1e-3), "mismatch vs reference"

    print("KERNEL_OK")
</pallas_src>

<mosaic_0001>
module attributes {stable_mosaic.version = 11 : i64} {
  func.func @dqn_kernel(%arg0: i32, %arg1: memref<8x128xf32, #tpu.memory_space<vmem>>, %arg2: memref<128x512xbf16, #tpu.memory_space<vmem>>, %arg3: memref<1x512xf32, #tpu.memory_space<vmem>>, %arg4: memref<512x512xbf16, #tpu.memory_space<vmem>>, %arg5: memref<1x512xf32, #tpu.memory_space<vmem>>, %arg6: memref<512x512xbf16, #tpu.memory_space<vmem>>, %arg7: memref<1x512xf32, #tpu.memory_space<vmem>>, %arg8: memref<512x128xbf16, #tpu.memory_space<vmem>>, %arg9: memref<1x128xf32, #tpu.memory_space<vmem>>, %arg10: memref<8x128xf32, #tpu.memory_space<vmem>>) attributes {dimension_semantics = [#tpu.dimension_semantics<parallel>], iteration_bounds = array<i64: 1>, scalar_prefetch = 0 : i64, scratch_operands = 0 : i64, tpu.core_type = #tpu.core_type<tc>, window_params = [{transform_indices = @transform_0, window_bounds = array<i64: 8, 128>}, {pipeline_mode = #tpu.pipeline_mode<synchronous>, transform_indices = @transform_1, window_bounds = array<i64: 128, 512>}, {pipeline_mode = #tpu.pipeline_mode<synchronous>, transform_indices = @transform_2, window_bounds = array<i64: 1, 512>}, {pipeline_mode = #tpu.pipeline_mode<synchronous>, transform_indices = @transform_3, window_bounds = array<i64: 512, 512>}, {pipeline_mode = #tpu.pipeline_mode<synchronous>, transform_indices = @transform_4, window_bounds = array<i64: 1, 512>}, {pipeline_mode = #tpu.pipeline_mode<synchronous>, transform_indices = @transform_5, window_bounds = array<i64: 512, 512>}, {pipeline_mode = #tpu.pipeline_mode<synchronous>, transform_indices = @transform_6, window_bounds = array<i64: 1, 512>}, {pipeline_mode = #tpu.pipeline_mode<synchronous>, transform_indices = @transform_7, window_bounds = array<i64: 512, 128>}, {pipeline_mode = #tpu.pipeline_mode<synchronous>, transform_indices = @transform_8, window_bounds = array<i64: 1, 128>}, {transform_indices = @transform_9, window_bounds = array<i64: 8, 128>}]} {
    %c0 = arith.constant 0 : index
    %c0_0 = arith.constant 0 : index
    %0 = vector.load %arg1[%c0, %c0_0] : memref<8x128xf32, #tpu.memory_space<vmem>>, vector<8x128xf32>
    %1 = arith.truncf %0 : vector<8x128xf32> to vector<8x128xbf16>
    %c0_1 = arith.constant 0 : index
    %c0_2 = arith.constant 0 : index
    %2 = vector.load %arg2[%c0_1, %c0_2] : memref<128x512xbf16, #tpu.memory_space<vmem>>, vector<128x512xbf16>
    %cst = arith.constant dense<0.000000e+00> : vector<8x512xf32>
    %3 = tpu.matmul %1, %2, %cst {dimension_numbers = #tpu.dot_dimension_numbers<[1], [0], [0], [1], [0, 0, 1, 1], [], []>} : vector<8x128xbf16>, vector<128x512xbf16>, vector<8x512xf32> -> vector<8x512xf32>
    %c0_3 = arith.constant 0 : index
    %c0_4 = arith.constant 0 : index
    %4 = vector.load %arg3[%c0_3, %c0_4] : memref<1x512xf32, #tpu.memory_space<vmem>>, vector<1x512xf32>
    %5 = vector.broadcast %4 : vector<1x512xf32> to vector<8x512xf32>
    %6 = arith.addf %3, %5 : vector<8x512xf32>
    %cst_5 = arith.constant 0.000000e+00 : f32
    %7 = vector.broadcast %cst_5 : f32 to vector<8x512xf32>
    %8 = arith.maximumf %6, %7 : vector<8x512xf32>
    %9 = arith.truncf %8 : vector<8x512xf32> to vector<8x512xbf16>
    %c0_6 = arith.constant 0 : index
    %c0_7 = arith.constant 0 : index
    %10 = vector.load %arg4[%c0_6, %c0_7] : memref<512x512xbf16, #tpu.memory_space<vmem>>, vector<512x512xbf16>
    %cst_8 = arith.constant dense<0.000000e+00> : vector<8x512xf32>
    %11 = tpu.matmul %9, %10, %cst_8 {dimension_numbers = #tpu.dot_dimension_numbers<[1], [0], [0], [1], [0, 0, 1, 1], [], []>} : vector<8x512xbf16>, vector<512x512xbf16>, vector<8x512xf32> -> vector<8x512xf32>
    %c0_9 = arith.constant 0 : index
    %c0_10 = arith.constant 0 : index
    %12 = vector.load %arg5[%c0_9, %c0_10] : memref<1x512xf32, #tpu.memory_space<vmem>>, vector<1x512xf32>
    %13 = vector.broadcast %12 : vector<1x512xf32> to vector<8x512xf32>
    %14 = arith.addf %11, %13 : vector<8x512xf32>
    %cst_11 = arith.constant 0.000000e+00 : f32
    %15 = vector.broadcast %cst_11 : f32 to vector<8x512xf32>
    %16 = arith.maximumf %14, %15 : vector<8x512xf32>
    %17 = arith.truncf %16 : vector<8x512xf32> to vector<8x512xbf16>
    %c0_12 = arith.constant 0 : index
    %c0_13 = arith.constant 0 : index
    %18 = vector.load %arg6[%c0_12, %c0_13] : memref<512x512xbf16, #tpu.memory_space<vmem>>, vector<512x512xbf16>
    %cst_14 = arith.constant dense<0.000000e+00> : vector<8x512xf32>
    %19 = tpu.matmul %17, %18, %cst_14 {dimension_numbers = #tpu.dot_dimension_numbers<[1], [0], [0], [1], [0, 0, 1, 1], [], []>} : vector<8x512xbf16>, vector<512x512xbf16>, vector<8x512xf32> -> vector<8x512xf32>
    %c0_15 = arith.constant 0 : index
    %c0_16 = arith.constant 0 : index
    %20 = vector.load %arg7[%c0_15, %c0_16] : memref<1x512xf32, #tpu.memory_space<vmem>>, vector<1x512xf32>
    %21 = vector.broadcast %20 : vector<1x512xf32> to vector<8x512xf32>
    %22 = arith.addf %19, %21 : vector<8x512xf32>
    %cst_17 = arith.constant 0.000000e+00 : f32
    %23 = vector.broadcast %cst_17 : f32 to vector<8x512xf32>
    %24 = arith.maximumf %22, %23 : vector<8x512xf32>
    %25 = arith.truncf %24 : vector<8x512xf32> to vector<8x512xbf16>
    %c0_18 = arith.constant 0 : index
    %c0_19 = arith.constant 0 : index
    %26 = vector.load %arg8[%c0_18, %c0_19] : memref<512x128xbf16, #tpu.memory_space<vmem>>, vector<512x128xbf16>
    %cst_20 = arith.constant dense<0.000000e+00> : vector<8x128xf32>
    %27 = tpu.matmul %25, %26, %cst_20 {dimension_numbers = #tpu.dot_dimension_numbers<[1], [0], [0], [1], [0, 0, 1, 1], [], []>} : vector<8x512xbf16>, vector<512x128xbf16>, vector<8x128xf32> -> vector<8x128xf32>
    %c0_21 = arith.constant 0 : index
    %c0_22 = arith.constant 0 : index
    %28 = vector.load %arg9[%c0_21, %c0_22] : memref<1x128xf32, #tpu.memory_space<vmem>>, vector<1x128xf32>
    %29 = vector.broadcast %28 : vector<1x128xf32> to vector<8x128xf32>
    %30 = arith.addf %27, %29 : vector<8x128xf32>
    %c0_23 = arith.constant 0 : index
    %c0_24 = arith.constant 0 : index
    %31 = vector.load %arg10[%c0_23, %c0_24] : memref<8x128xf32, #tpu.memory_space<vmem>>, vector<8x128xf32>
    tpu.vector_store %arg10[%c0_23, %c0_24], %30 {strides = array<i32>} : memref<8x128xf32, #tpu.memory_space<vmem>>, vector<8x128xf32>,
    return
  }
  func.func @transform_0(%arg0: i32) -> (i32, i32) {
    %c0_i32 = arith.constant 0 : i32
    %c0_i32_0 = arith.constant 0 : i32
    return %arg0, %c0_i32 : i32, i32
  }
  func.func @transform_1(%arg0: i32) -> (i32, i32) {
    %c0_i32 = arith.constant 0 : i32
    %c0_i32_0 = arith.constant 0 : i32
    %c0_i32_1 = arith.constant 0 : i32
    return %c0_i32, %c0_i32_0 : i32, i32
  }
  func.func @transform_2(%arg0: i32) -> (i32, i32) {
    %c0_i32 = arith.constant 0 : i32
    %c0_i32_0 = arith.constant 0 : i32
    %c0_i32_1 = arith.constant 0 : i32
    return %c0_i32, %c0_i32_0 : i32, i32
  }
  func.func @transform_3(%arg0: i32) -> (i32, i32) {
    %c0_i32 = arith.constant 0 : i32
    %c0_i32_0 = arith.constant 0 : i32
    %c0_i32_1 = arith.constant 0 : i32
    return %c0_i32, %c0_i32_0 : i32, i32
  }
  func.func @transform_4(%arg0: i32) -> (i32, i32) {
    %c0_i32 = arith.constant 0 : i32
    %c0_i32_0 = arith.constant 0 : i32
    %c0_i32_1 = arith.constant 0 : i32
    return %c0_i32, %c0_i32_0 : i32, i32
  }
  func.func @transform_5(%arg0: i32) -> (i32, i32) {
    %c0_i32 = arith.constant 0 : i32
    %c0_i32_0 = arith.constant 0 : i32
    %c0_i32_1 = arith.constant 0 : i32
    return %c0_i32, %c0_i32_0 : i32, i32
  }
  func.func @transform_6(%arg0: i32) -> (i32, i32) {
    %c0_i32 = arith.constant 0 : i32
    %c0_i32_0 = arith.constant 0 : i32
    %c0_i32_1 = arith.constant 0 : i32
    return %c0_i32, %c0_i32_0 : i32, i32
  }
  func.func @transform_7(%arg0: i32) -> (i32, i32) {
    %c0_i32 = arith.constant 0 : i32
    %c0_i32_0 = arith.constant 0 : i32
    %c0_i32_1 = arith.constant 0 : i32
    return %c0_i32, %c0_i32_0 : i32, i32
  }
  func.func @transform_8(%arg0: i32) -> (i32, i32) {
    %c0_i32 = arith.constant 0 : i32
    %c0_i32_0 = arith.constant 0 : i32
    %c0_i32_1 = arith.constant 0 : i32
    return %c0_i32, %c0_i32_0 : i32, i32
  }
  func.func @transform_9(%arg0: i32) -> (i32, i32) {
    %c0_i32 = arith.constant 0 : i32
    %c0_i32_0 = arith.constant 0 : i32
    return %arg0, %c0_i32 : i32, i32
  }
}

</mosaic_0001>

<bundles_post_ra>
// kernel: tpu_custom_call.1
= control target key start
LH: loop header
LB: loop body
LE: loop exit
PB: predicated region body
PF: predicated region fallthrough
CT: control target
= control target key end

     0   :  { %14 = vsyncpa [#allocation3], 0  ;;  %s3893_s0 = inlined_call_operand.hbm [shape: f32[8,128], index: 0, kind: input, shape index: {}]   ;;  %s3894_s1 = inlined_call_operand.hbm [shape: bf16[128,512], index: 1, kind: input, shape index: {}]   ;;  %s3895_s2 = inlined_call_operand.vmem [shape: f32[1,512], index: 2, kind: input, shape index: {}]   ;;  %s3896_s3 = inlined_call_operand.hbm [shape: bf16[512,512], index: 3, kind: input, shape index: {}]   ;;  %s3897_s4 = inlined_call_operand.vmem [shape: f32[1,512], index: 4, kind: input, shape index: {}]   ;;  %s3898_s5 = inlined_call_operand.hbm [shape: bf16[512,512], index: 5, kind: input, shape index: {}]   ;;  %s3899_s6 = inlined_call_operand.vmem [shape: f32[1,512], index: 6, kind: input, shape index: {}]   ;;  %s3900_s7 = inlined_call_operand.hbm [shape: bf16[512,128], index: 7, kind: input, shape index: {}]   ;;  %s3901_s8 = inlined_call_operand.vmem [shape: f32[1,128], index: 8, kind: input, shape index: {}]   ;;  %s3902_s9 = inlined_call_operand.hbm [shape: f32[8,128], index: 9, kind: output, shape index: {}]  }
   0x1   :  { %15 = vsyncpa [#allocation6], 0 }
   0x2   :  { %16 = vsyncpa [#allocation9], 0 }
   0x3   :  { %17 = vsyncpa [#allocation4], 0  ;;  %s3695_s30 = smov [#allocation5]   ;;  %s3555_s13 = scalar_lea.hbm %s3894_s1, 4096 }
   0x4   :  { %s33_s10 = sshll.u32 %s3695_s30, 4  ;;  %p3556_p0 = scmp.ne.s32.totalorder %s3894_s1, %s3555_s13  ;;  %s34_s10 = int_to_ptr.vmem [resolvable:$true] %s33_s10 }
   0x5   :  { %p3559_p1 = scmp.lt.u32.totalorder %s3555_s13, %s3894_s1 }
   0x7   :  { %p3561_p2 = pnand %p3559_p1, %p3556_p0 }
   0x9   :  { %3564 = shalt.err (!%p3561_p2)
}
   0xa   :  { %s3565_s18 = scalar_lea.vmem %s34_s10, 4096  ;;  %p3570_p4 = scmp.lt.s32.totalorder %s34_s10, %s34_s10 }
   0xb   :  { %p3566_p3 = scmp.ne.s32.totalorder %s34_s10, %s3565_s18  ;;  %p3571_p5 = scmp.lt.s32.totalorder %s3565_s18, %s3565_s18 }
   0xd   :  { %p3572_p6 = por %p3571_p5, %p3570_p4 }
   0xf   :  { %p3573_p7 = pnand %p3572_p6, %p3566_p3 }
  0x11   :  { %3576 = shalt.err (!%p3573_p7)
}
  0x12   :  { %s3696_s19 = smov 256   ;;  %s3697_s20 = smov 16  }
  0x13   :  { %39 = dma.hbm_to_vmem [thread:$0]  %s3894_s1, 4096, %s34_s10, [#allocation6], %s3696_s19, %s3696_s19, %s3697_s20  }
  0x14   :  { %s3698_s23 = smov [#allocation8]   ;;  %s3699_s25 = smov [#allocation2]  }
  0x15   :  { %s61_s24 = sshll.u32 %s3698_s23, 4  ;;  %s24_s26 = sshll.u32 %s3699_s25, 4  ;;  %s62_s24 = int_to_ptr.vmem [resolvable:$true] %s61_s24  ;;  %s25_s26 = int_to_ptr.vmem [resolvable:$true] %s24_s26 }
  0x16   :  { %s3577_s29 = scalar_lea.hbm %s3898_s5, 16384 }
  0x17   :  { %p3578_p8 = scmp.ne.s32.totalorder %s3898_s5, %s3577_s29  ;;  %p3581_p9 = scmp.lt.u32.totalorder %s3577_s29, %s3898_s5 }
  0x19   :  { %p3583_p10 = pnand %p3581_p9, %p3578_p8 }
  0x1b   :  { %3586 = shalt.err (!%p3583_p10)
}
  0x1c   :  { %s3587_s1 = scalar_lea.vmem %s62_s24, 16384  ;;  %p3592_p12 = scmp.lt.s32.totalorder %s62_s24, %s62_s24 }
  0x1d   :  { %p3588_p11 = scmp.ne.s32.totalorder %s62_s24, %s3587_s1  ;;  %p3593_p13 = scmp.lt.s32.totalorder %s3587_s1, %s3587_s1 }
  0x1f   :  { %p3594_p0 = por %p3593_p13, %p3592_p12 }
  0x21   :  { %p3595_p1 = pnand %p3594_p0, %p3588_p11 }
  0x23   :  { %3598 = shalt.err (!%p3595_p1)
}
  0x24   :  { %67 = dma.hbm_to_vmem [thread:$0]  %s3898_s5, 16384, %s62_s24, [#allocation9], %s3696_s19, %s3696_s19, %s3697_s20  }
  0x25   :  { %s3599_s17 = scalar_lea.hbm %s3893_s0, 128 }
  0x26   :  { %p3600_p2 = scmp.ne.s32.totalorder %s3893_s0, %s3599_s17  ;;  %p3603_p3 = scmp.lt.u32.totalorder %s3599_s17, %s3893_s0 }
  0x28   :  { %p3605_p4 = pnand %p3603_p3, %p3600_p2 }
  0x2a   :  { %3608 = shalt.err (!%p3605_p4)
}
  0x2b   :  { %s3609_s25 = scalar_lea.vmem %s25_s26, 128  ;;  %p3614_p6 = scmp.lt.s32.totalorder %s25_s26, %s25_s26 }
  0x2c   :  { %p3610_p5 = scmp.ne.s32.totalorder %s25_s26, %s3609_s25  ;;  %p3615_p7 = scmp.lt.s32.totalorder %s3609_s25, %s3609_s25 }
  0x2e   :  { %p3616_p8 = por %p3615_p7, %p3614_p6 }
  0x30   :  { %p3617_p9 = pnand %p3616_p8, %p3610_p5 }
  0x32   :  { %3620 = shalt.err (!%p3617_p9)
}
  0x33   :  { %27 = dma.hbm_to_vmem [thread:$0]  %s3893_s0, 128, %s25_s26, [#allocation3]  }
  0x34   :  { %s3700_s27 = smov [#allocation7]   ;;  %s3701_s29 = smov [#allocation10]  }
  0x35   :  { %s47_s28 = sshll.u32 %s3700_s27, 4  ;;  %s75_s30 = sshll.u32 %s3701_s29, 4  ;;  %s48_s28 = int_to_ptr.vmem [resolvable:$true] %s47_s28  ;;  %s76_s30 = int_to_ptr.vmem [resolvable:$true] %s75_s30 }
  0x36   :  { %s3621_s13 = scalar_lea.hbm %s3896_s3, 16384 }
  0x37   :  { %p3622_p10 = scmp.ne.s32.totalorder %s3896_s3, %s3621_s13  ;;  %p3625_p11 = scmp.lt.u32.totalorder %s3621_s13, %s3896_s3 }
  0x39   :  { %p3627_p12 = pnand %p3625_p11, %p3622_p10 }
  0x3b   :  { %3630 = shalt.err (!%p3627_p12)
}
  0x3c   :  { %s3631_s0 = scalar_lea.vmem %s48_s28, 16384  ;;  %p3636_p0 = scmp.lt.s32.totalorder %s48_s28, %s48_s28 }
  0x3d   :  { %p3632_p13 = scmp.ne.s32.totalorder %s48_s28, %s3631_s0  ;;  %p3637_p1 = scmp.lt.s32.totalorder %s3631_s0, %s3631_s0 }
  0x3f   :  { %p3638_p2 = por %p3637_p1, %p3636_p0 }
  0x41   :  { %p3639_p3 = pnand %p3638_p2, %p3632_p13 }
  0x43   :  { %3642 = shalt.err (!%p3639_p3)
}
  0x44   :  { %53 = dma.hbm_to_vmem [thread:$0]  %s3896_s3, 16384, %s48_s28, [#allocation6], %s3696_s19, %s3696_s19, %s3697_s20  }
  0x45   :  { %s3643_s21 = scalar_lea.hbm %s3900_s7, 4096 }
  0x46   :  { %p3644_p4 = scmp.ne.s32.totalorder %s3900_s7, %s3643_s21  ;;  %p3647_p5 = scmp.lt.u32.totalorder %s3643_s21, %s3900_s7 }
  0x48   :  { %p3649_p6 = pnand %p3647_p5, %p3644_p4 }
  0x4a   :  { %3652 = shalt.err (!%p3649_p6)
}
  0x4b   :  { %s3653_s24 = scalar_lea.vmem %s76_s30, 4096  ;;  %p3658_p8 = scmp.lt.s32.totalorder %s76_s30, %s76_s30 }
  0x4c   :  { %p3654_p7 = scmp.ne.s32.totalorder %s76_s30, %s3653_s24  ;;  %p3659_p9 = scmp.lt.s32.totalorder %s3653_s24, %s3653_s24 }
  0x4e   :  { %p3660_p10 = por %p3659_p9, %p3658_p8 }
  0x50   :  { %p3661_p11 = pnand %p3660_p10, %p3654_p7 }
  0x52   :  { %3664 = shalt.err (!%p3661_p11)
}
  0x53   :  { %s3702_s3 = smov 64   ;;  %s3703_s19 = smov 4  }
  0x54   :  { %81 = dma.hbm_to_vmem [thread:$0]  %s3900_s7, 4096, %s76_s30, [#allocation9], %s3702_s3, %s3702_s3, %s3703_s19  }
  0x55   :  { %3687 = dma.done.wait [#allocation3], 128  }
  0x56   :  { %3688 = vsyncadd [#allocation3], 4294967168 }
  0x57   :  { %3689 = dma.done.wait [#allocation6], 20480  }
  0x58   :  { %3690 = vsyncadd [#allocation6], 4294946816 }
  0x59   :  { %3691 = dma.done.wait [#allocation9], 20480  }
  0x5a   :  { %3692 = vsyncadd [#allocation9], 4294946816  ;;  %v3704_v0 = vmov 0   ;;  %v3091_v1 = vld [vmem:[#allocation5 + $0x4] ss:$16 sps:$4 sm:$0xff]   ;;  %v100_v26 = vld [vmem:[#allocation2] sm:$0xff] }
  0x5b   :  { %348 = vmatprep.mubr.bf16.mxu0 %v3704_v0  ;;  %389 = vmatprep.mubr.bf16.mxu1 %v3704_v0  ;;  %v3093_v2 = vld [vmem:[#allocation5] ss:$16 sps:$4 sm:$0xff]   ;;  %v3094_v3 = vld [vmem:[#allocation5 + $0x24] ss:$16 sps:$4 sm:$0xff]   ;;  %v3115_v10 = vld [vmem:[#allocation5 + $0xc] ss:$16 sps:$4 sm:$0xff]   ;;  %v101_v30 = vpack.c.bf16 %v100_v26, %v100_v26 }
  0x5c   :  { %316 = vmatprep.subr.bf16.mxu0 %v3091_v1  ;;  %v3096_v4 = vld [vmem:[#allocation5 + $0x20] ss:$16 sps:$4 sm:$0xff]   ;;  %v3097_v5 = vld [vmem:[#allocation5 + $0x44] ss:$16 sps:$4 sm:$0xff]   ;;  %v3117_v11 = vld [vmem:[#allocation5 + $0x8] ss:$16 sps:$4 sm:$0xff]   ;;  %357 = vmatprep.subr.bf16.mxu1 %v3115_v10 }
  0x5d   :  { %317 = vmatpush1.bf16.msra.mxu0 %v3093_v2  ;;  %v3099_v6 = vld [vmem:[#allocation5 + $0x40] ss:$16 sps:$4 sm:$0xff]   ;;  %v3100_v7 = vld [vmem:[#allocation5 + $0x64] ss:$16 sps:$4 sm:$0xff]   ;;  %v3118_v12 = vld [vmem:[#allocation5 + $0x2c] ss:$16 sps:$4 sm:$0xff]   ;;  %358 = vmatpush1.bf16.msra.mxu1 %v3117_v11 }
  0x5e   :  { %318 = vmatprep.subr.bf16.mxu0 %v3094_v3  ;;  %v3102_v8 = vld [vmem:[#allocation5 + $0x60] ss:$16 sps:$4 sm:$0xff]   ;;  %v3103_v9 = vld [vmem:[#allocation5 + $0x84] ss:$16 sps:$4 sm:$0xff]   ;;  %v3120_v14 = vld [vmem:[#allocation5 + $0x28] ss:$16 sps:$4 sm:$0xff]   ;;  %359 = vmatprep.subr.bf16.mxu1 %v3118_v12 }
  0x5f   :  { %v3105_v13 = vld [vmem:[#allocation5 + $0x80] ss:$16 sps:$4 sm:$0xff]   ;;  %v3121_v15 = vld [vmem:[#allocation5 + $0x4c] ss:$16 sps:$4 sm:$0xff]   ;;  %v3106_v16 = vld [vmem:[#allocation5 + $0xa4] ss:$16 sps:$4 sm:$0xff]  }
  0x60   :  { %v3108_v17 = vld [vmem:[#allocation5 + $0xa0] ss:$16 sps:$4 sm:$0xff]   ;;  %v3123_v18 = vld [vmem:[#allocation5 + $0x48] ss:$16 sps:$4 sm:$0xff]   ;;  %v3124_v19 = vld [vmem:[#allocation5 + $0x6c] ss:$16 sps:$4 sm:$0xff]  }
  0x61   :  { %319 = vmatpush1.bf16.msra.mxu0 %v3096_v4  ;;  %360 = vmatpush1.bf16.msra.mxu1 %v3120_v14  ;;  %v3109_v20 = vld [vmem:[#allocation5 + $0xc4] ss:$16 sps:$4 sm:$0xff]   ;;  %v3111_v21 = vld [vmem:[#allocation5 + $0xc0] ss:$16 sps:$4 sm:$0xff]   ;;  %v3126_v22 = vld [vmem:[#allocation5 + $0x68] ss:$16 sps:$4 sm:$0xff]  }
  0x62   :  { %320 = vmatprep.subr.bf16.mxu0 %v3097_v5  ;;  %361 = vmatprep.subr.bf16.mxu1 %v3121_v15  ;;  %v3127_v23 = vld [vmem:[#allocation5 + $0x8c] ss:$16 sps:$4 sm:$0xff]   ;;  %v3112_v24 = vld [vmem:[#allocation5 + $0xe4] ss:$16 sps:$4 sm:$0xff]   ;;  %v3114_v25 = vld [vmem:[#allocation5 + $0xe0] ss:$16 sps:$4 sm:$0xff]  }
  0x63   :  { %v3129_v27 = vld [vmem:[#allocation5 + $0x88] ss:$16 sps:$4 sm:$0xff]   ;;  %v3130_v28 = vld [vmem:[#allocation5 + $0xac] ss:$16 sps:$4 sm:$0xff]   ;;  %v3141_v29 = vld [vmem:[#allocation7 + $0x4] ss:$16 sps:$4 sm:$0xff]  }
  0x64   :  { %v3132_v31 = vld [vmem:[#allocation5 + $0xa8] ss:$16 sps:$4 sm:$0xff]   ;;  %v3133_v32 = vld [vmem:[#allocation5 + $0xcc] ss:$16 sps:$4 sm:$0xff]   ;;  %v3139_v33 = vld [vmem:[#allocation7] ss:$16 sps:$4 sm:$0xff]  }
  0x65   :  { %321 = vmatpush1.bf16.msra.mxu0 %v3099_v6  ;;  %362 = vmatpush1.bf16.msra.mxu1 %v3123_v18  ;;  %v3147_v34 = vld [vmem:[#allocation7 + $0x24] ss:$16 sps:$4 sm:$0xff]   ;;  %v3135_v35 = vld [vmem:[#allocation5 + $0xc8] ss:$16 sps:$4 sm:$0xff]   ;;  %v3136_v36 = vld [vmem:[#allocation5 + $0xec] ss:$16 sps:$4 sm:$0xff]  }
  0x66   :  { %322 = vmatprep.subr.bf16.mxu0 %v3100_v7  ;;  %363 = vmatprep.subr.bf16.mxu1 %v3124_v19  ;;  %v3145_v37 = vld [vmem:[#allocation7 + $0x20] ss:$16 sps:$4 sm:$0xff]   ;;  %v3153_v38 = vld [vmem:[#allocation7 + $0x44] ss:$16 sps:$4 sm:$0xff]   ;;  %v3138_v39 = vld [vmem:[#allocation5 + $0xe8] ss:$16 sps:$4 sm:$0xff]  }
  0x67   :  { %v3144_v40 = vld [vmem:[#allocation7 + $0xc] ss:$16 sps:$4 sm:$0xff]   ;;  %v3151_v41 = vld [vmem:[#allocation7 + $0x40] ss:$16 sps:$4 sm:$0xff]   ;;  %v3159_v42 = vld [vmem:[#allocation7 + $0x64] ss:$16 sps:$4 sm:$0xff]  }
  0x68   :  { %v3142_v43 = vld [vmem:[#allocation7 + $0x8] ss:$16 sps:$4 sm:$0xff]   ;;  %v3150_v44 = vld [vmem:[#allocation7 + $0x2c] ss:$16 sps:$4 sm:$0xff]   ;;  %v3157_v45 = vld [vmem:[#allocation7 + $0x60] ss:$16 sps:$4 sm:$0xff]  }
  0x69   :  { %323 = vmatpush1.bf16.msra.mxu0 %v3102_v8  ;;  %364 = vmatpush1.bf16.msra.mxu1 %v3126_v22  ;;  %v3165_v46 = vld [vmem:[#allocation7 + $0x84] ss:$16 sps:$4 sm:$0xff]   ;;  %v3148_v47 = vld [vmem:[#allocation7 + $0x28] ss:$16 sps:$4 sm:$0xff]   ;;  %v3156_v48 = vld [vmem:[#allocation7 + $0x4c] ss:$16 sps:$4 sm:$0xff]  }
  0x6a   :  { %324 = vmatprep.subr.bf16.mxu0 %v3103_v9  ;;  %365 = vmatprep.subr.bf16.mxu1 %v3127_v23  ;;  %v3163_v49 = vld [vmem:[#allocation7 + $0x80] ss:$16 sps:$4 sm:$0xff]   ;;  %v3171_v50 = vld [vmem:[#allocation7 + $0xa4] ss:$16 sps:$4 sm:$0xff]   ;;  %v3154_v51 = vld [vmem:[#allocation7 + $0x48] ss:$16 sps:$4 sm:$0xff]  }
  0x6b   :  { %v3162_v52 = vld [vmem:[#allocation7 + $0x6c] ss:$16 sps:$4 sm:$0xff]   ;;  %v3169_v53 = vld [vmem:[#allocation7 + $0xa0] ss:$16 sps:$4 sm:$0xff]   ;;  %v3177_v54 = vld [vmem:[#allocation7 + $0xc4] ss:$16 sps:$4 sm:$0xff]  }
  0x6c   :  { %v3160_v55 = vld [vmem:[#allocation7 + $0x68] ss:$16 sps:$4 sm:$0xff]   ;;  %v3168_v56 = vld [vmem:[#allocation7 + $0x8c] ss:$16 sps:$4 sm:$0xff]   ;;  %v3175_v57 = vld [vmem:[#allocation7 + $0xc0] ss:$16 sps:$4 sm:$0xff]  }
  0x6d   :  { %325 = vmatpush1.bf16.msra.mxu0 %v3105_v13  ;;  %366 = vmatpush1.bf16.msra.mxu1 %v3129_v27  ;;  %v3183_v58 = vld [vmem:[#allocation7 + $0xe4] ss:$16 sps:$4 sm:$0xff]   ;;  %v3166_v59 = vld [vmem:[#allocation7 + $0x88] ss:$16 sps:$4 sm:$0xff]   ;;  %v3174_v60 = vld [vmem:[#allocation7 + $0xac] ss:$16 sps:$4 sm:$0xff]  }
  0x6e   :  { %326 = vmatprep.subr.bf16.mxu0 %v3106_v16  ;;  %367 = vmatprep.subr.bf16.mxu1 %v3130_v28  ;;  %v3181_v61 = vld [vmem:[#allocation7 + $0xe0] ss:$16 sps:$4 sm:$0xff]   ;;  %v3189_v62 = vld [vmem:[#allocation7 + $0x104] ss:$16 sps:$4 sm:$0xff]   ;;  %v3172_v63 = vld [vmem:[#allocation7 + $0xa8] ss:$16 sps:$4 sm:$0xff]  }
  0x6f   :  { %v3180_v0 = vld [vmem:[#allocation7 + $0xcc] ss:$16 sps:$4 sm:$0xff]   ;;  %v3187_v1 = vld [vmem:[#allocation7 + $0x100] ss:$16 sps:$4 sm:$0xff]   ;;  %v3195_v2 = vld [vmem:[#allocation7 + $0x124] ss:$16 sps:$4 sm:$0xff]  }
  0x70   :  { %v3178_v3 = vld [vmem:[#allocation7 + $0xc8] ss:$16 sps:$4 sm:$0xff]   ;;  %v3186_v4 = vld [vmem:[#allocation7 + $0xec] ss:$16 sps:$4 sm:$0xff]   ;;  %v3193_v5 = vld [vmem:[#allocation7 + $0x120] ss:$16 sps:$4 sm:$0xff]  }
  0x71   :  { %327 = vmatpush1.bf16.msra.mxu0 %v3108_v17  ;;  %368 = vmatpush1.bf16.msra.mxu1 %v3132_v31  ;;  %v3201_v6 = vld [vmem:[#allocation7 + $0x144] ss:$16 sps:$4 sm:$0xff]   ;;  %v3184_v7 = vld [vmem:[#allocation7 + $0xe8] ss:$16 sps:$4 sm:$0xff]   ;;  %v3192_v8 = vld [vmem:[#allocation7 + $0x10c] ss:$16 sps:$4 sm:$0xff]  }
  0x72   :  { %328 = vmatprep.subr.bf16.mxu0 %v3109_v20  ;;  %369 = vmatprep.subr.bf16.mxu1 %v3133_v32  ;;  %v3199_v9 = vld [vmem:[#allocation7 + $0x140] ss:$16 sps:$4 sm:$0xff]   ;;  %v3207_v10 = vld [vmem:[#allocation7 + $0x164] ss:$16 sps:$4 sm:$0xff]   ;;  %v3190_v11 = vld [vmem:[#allocation7 + $0x108] ss:$16 sps:$4 sm:$0xff]  }
  0x73   :  { %v3198_v12 = vld [vmem:[#allocation7 + $0x12c] ss:$16 sps:$4 sm:$0xff]   ;;  %v3205_v13 = vld [vmem:[#allocation7 + $0x160] ss:$16 sps:$4 sm:$0xff]   ;;  %v3213_v14 = vld [vmem:[#allocation7 + $0x184] ss:$16 sps:$4 sm:$0xff]  }
  0x74   :  { %v3196_v15 = vld [vmem:[#allocation7 + $0x128] ss:$16 sps:$4 sm:$0xff]   ;;  %v3204_v16 = vld [vmem:[#allocation7 + $0x14c] ss:$16 sps:$4 sm:$0xff]   ;;  %v3211_v17 = vld [vmem:[#allocation7 + $0x180] ss:$16 sps:$4 sm:$0xff]  }
  0x75   :  { %329 = vmatpush1.bf16.msra.mxu0 %v3111_v21  ;;  %370 = vmatpush1.bf16.msra.mxu1 %v3135_v35  ;;  %v3219_v18 = vld [vmem:[#allocation7 + $0x1a4] ss:$16 sps:$4 sm:$0xff]   ;;  %v3202_v19 = vld [vmem:[#allocation7 + $0x148] ss:$16 sps:$4 sm:$0xff]   ;;  %v3210_v20 = vld [vmem:[#allocation7 + $0x16c] ss:$16 sps:$4 sm:$0xff]  }
  0x76   :  { %330 = vmatprep.subr.bf16.mxu0 %v3112_v24  ;;  %371 = vmatprep.subr.bf16.mxu1 %v3136_v36  ;;  %v3217_v21 = vld [vmem:[#allocation7 + $0x1a0] ss:$16 sps:$4 sm:$0xff]   ;;  %v3208_v22 = vld [vmem:[#allocation7 + $0x168] ss:$16 sps:$4 sm:$0xff]   ;;  %v3216_v23 = vld [vmem:[#allocation7 + $0x18c] ss:$16 sps:$4 sm:$0xff]  }
  0x77   :  { %v3214_v24 = vld [vmem:[#allocation7 + $0x188] ss:$16 sps:$4 sm:$0xff]   ;;  %v3225_v27 = vld [vmem:[#allocation7 + $0x1c4] ss:$16 sps:$4 sm:$0xff]   ;;  %v3228_v28 = vld [vmem:[#allocation7 + $0x1cc] ss:$16 sps:$4 sm:$0xff]  }
  0x78   :  { %v3220_v26 = vld [vmem:[#allocation7 + $0x1a8] ss:$16 sps:$4 sm:$0xff]   ;;  %v3231_v31 = vld [vmem:[#allocation7 + $0x1e4] ss:$16 sps:$4 sm:$0xff]   ;;  %v3234_v32 = vld [vmem:[#allocation7 + $0x1ec] ss:$16 sps:$4 sm:$0xff]  }
  0x79   :  { %331 = vmatpush1.bf16.msra.mxu0 %v3114_v25  ;;  %372 = vmatpush1.bf16.msra.mxu1 %v3138_v39  ;;  %v3222_v25 = vld [vmem:[#allocation7 + $0x1ac] ss:$16 sps:$4 sm:$0xff]   ;;  %v3237_v35 = vld [vmem:[#allocation7 + $0x204] ss:$16 sps:$4 sm:$0xff]   ;;  %s3705_s12 = smov [#allocation11]  }
  0x7a   :  { %1196 = vmatprep.subr.bf16.mxu0 %v3141_v29  ;;  %1278 = vmatprep.subr.bf16.mxu1 %v3144_v40  ;;  %v3223_v29 = vld [vmem:[#allocation7 + $0x1c0] ss:$16 sps:$4 sm:$0xff]   ;;  %v3240_v36 = vld [vmem:[#allocation7 + $0x20c] ss:$16 sps:$4 sm:$0xff]   ;;  %v3833_v40 = vld [vmem:[%s3895_s2] sm:$0xf] }
  0x7b   :  { %s2680_s13 = sshll.u32 %s3705_s12, 4  ;;  %s2681_s13 = int_to_ptr.vmem [resolvable:$true] %s2680_s13 }
  0x7c   :  { %349 = vmatmul.mubr.bf16.vlgmr.msra.gmra.mrb[0].mxu0 %v101_v30  ;;  %390 = vmatmul.mubr.bf16.vlgmr.msra.gmra.mrb[0].mxu1 %v101_v30  ;;  %v3226_v30 = vld [vmem:[#allocation7 + $0x1c8] ss:$16 sps:$4 sm:$0xff]   ;;  %s3665_s1 = scalar_lea.vmem %s2681_s13, 128  ;;  %p3670_p13 = scmp.lt.s32.totalorder %s2681_s13, %s2681_s13 }
  0x7d   :  { %1197 = vmatpush1.bf16.msra.mxu0 %v3139_v33  ;;  %1279 = vmatpush1.bf16.msra.mxu1 %v3142_v43  ;;  %v3229_v33 = vld [vmem:[#allocation7 + $0x1e0] ss:$16 sps:$4 sm:$0xff]   ;;  %p3666_p12 = scmp.ne.s32.totalorder %s2681_s13, %s3665_s1  ;;  %p3671_p0 = scmp.lt.s32.totalorder %s3665_s1, %s3665_s1 }
  0x7e   :  { %1198 = vmatprep.subr.bf16.mxu0 %v3147_v34  ;;  %1280 = vmatprep.subr.bf16.mxu1 %v3150_v44  ;;  %v3232_v34 = vld [vmem:[#allocation7 + $0x1e8] ss:$16 sps:$4 sm:$0xff]  }
  0x7f   :  { %p3672_p1 = por %p3671_p0, %p3670_p13 }
  0x81   :  { %1199 = vmatpush1.bf16.msra.mxu0 %v3145_v37  ;;  %1281 = vmatpush1.bf16.msra.mxu1 %v3148_v47  ;;  %v136_v37 = vlaneseq  ;;  %p3673_p2 = pnand %p3672_p1, %p3666_p12 }
  0x82   :  { %1200 = vmatprep.subr.bf16.mxu0 %v3153_v38  ;;  %1282 = vmatprep.subr.bf16.mxu1 %v3156_v48 }
  0x83   :  { %v3825_v38 = vshrl.u32 %v136_v37, 7  ;;  %v3297_v37 = vld [vmem:[#allocation7 + $0x344] ss:$16 sps:$4 sm:$0xff]  }
  0x85   :  { %1201 = vmatpush1.bf16.msra.mxu0 %v3151_v41  ;;  %1283 = vmatpush1.bf16.msra.mxu1 %v3154_v51  ;;  %v3828_v39 = vsub.s32 0, %v3825_v38  ;;  %v3836_v41 = vsub.s32 1, %v3825_v38 }
  0x86   :  { %1202 = vmatprep.subr.bf16.mxu0 %v3159_v42  ;;  %1284 = vmatprep.subr.bf16.mxu1 %v3162_v52  ;;  %v3843_v52 = vsub.s32 3, %v3825_v38 }
  0x87   :  { %v139_v42 = vrot.slane %v3833_v40, %v3828_v39  ;;  %v143_v43 = vrot.slane %v3833_v40, %v3836_v41 }
  0x89   :  { %1203 = vmatpush1.bf16.msra.mxu0 %v3157_v45  ;;  %1285 = vmatpush1.bf16.msra.mxu1 %v3160_v55  ;;  %v3238_v55 = vld [vmem:[#allocation7 + $0x208] ss:$16 sps:$4 sm:$0xff]  }
  0x8a   :  { %1204 = vmatprep.subr.bf16.mxu0 %v3165_v46  ;;  %1286 = vmatprep.subr.bf16.mxu1 %v3168_v56 }
  0x8d   :  { %1205 = vmatpush1.bf16.msra.mxu0 %v3163_v49  ;;  %1287 = vmatpush1.bf16.msra.mxu1 %v3166_v59  ;;  %v151_v59 = vrot.slane %v3833_v40, %v3843_v52 }
  0x8e   :  { %1206 = vmatprep.subr.bf16.mxu0 %v3171_v50  ;;  %1288 = vmatprep.subr.bf16.mxu1 %v3174_v60  ;;  %v3241_v60 = vld [vmem:[#allocation7 + $0x220] ss:$16 sps:$4 sm:$0xff]  }
  0x91   :  { %1207 = vmatpush1.bf16.msra.mxu0 %v3169_v53  ;;  %1289 = vmatpush1.bf16.msra.mxu1 %v3172_v63  ;;  %v3252_v63 = vld [vmem:[#allocation7 + $0x24c] ss:$16 sps:$4 sm:$0xff]  }
  0x92   :  { %1208 = vmatprep.subr.bf16.mxu0 %v3177_v54  ;;  %1290 = vmatprep.subr.bf16.mxu1 %v3180_v0  ;;  %v3235_v54 = vld [vmem:[#allocation7 + $0x200] ss:$16 sps:$4 sm:$0xff]  }
  0x95   :  { %1209 = vmatpush1.bf16.msra.mxu0 %v3175_v57  ;;  %1291 = vmatpush1.bf16.msra.mxu1 %v3178_v3  ;;  %v3243_v57 = vld [vmem:[#allocation7 + $0x224] ss:$16 sps:$4 sm:$0xff]  }
  0x96   :  { %1210 = vmatprep.subr.bf16.mxu0 %v3183_v58  ;;  %1292 = vmatprep.subr.bf16.mxu1 %v3186_v4  ;;  %v3246_v58 = vld [vmem:[#allocation7 + $0x22c] ss:$16 sps:$4 sm:$0xff]   ;;  %v3247_v4 = vld [vmem:[#allocation7 + $0x240] ss:$16 sps:$4 sm:$0xff]  }
  0x99   :  { %1211 = vmatpush1.bf16.msra.mxu0 %v3181_v61  ;;  %1293 = vmatpush1.bf16.msra.mxu1 %v3184_v7  ;;  %v3244_v61 = vld [vmem:[#allocation7 + $0x228] ss:$16 sps:$4 sm:$0xff]   ;;  %v3255_v7 = vld [vmem:[#allocation7 + $0x264] ss:$16 sps:$4 sm:$0xff]  }
  0x9a   :  { %1212 = vmatprep.subr.bf16.mxu0 %v3189_v62  ;;  %1294 = vmatprep.subr.bf16.mxu1 %v3192_v8  ;;  %v3249_v62 = vld [vmem:[#allocation7 + $0x244] ss:$16 sps:$4 sm:$0xff]   ;;  %v3258_v8 = vld [vmem:[#allocation7 + $0x26c] ss:$16 sps:$4 sm:$0xff]  }
  0x9d   :  { %1213 = vmatpush1.bf16.msra.mxu0 %v3187_v1  ;;  %1295 = vmatpush1.bf16.msra.mxu1 %v3190_v11  ;;  %v3253_v11 = vld [vmem:[#allocation7 + $0x260] ss:$16 sps:$4 sm:$0xff]  }
  0x9e   :  { %1214 = vmatprep.subr.bf16.mxu0 %v3195_v2  ;;  %1296 = vmatprep.subr.bf16.mxu1 %v3198_v12  ;;  %v3256_v12 = vld [vmem:[#allocation7 + $0x268] ss:$16 sps:$4 sm:$0xff]  }
  0xa1   :  { %1215 = vmatpush1.bf16.msra.mxu0 %v3193_v5  ;;  %1297 = vmatpush1.bf16.msra.mxu1 %v3196_v15  ;;  %v3250_v5 = vld [vmem:[#allocation7 + $0x248] ss:$16 sps:$4 sm:$0xff]   ;;  %v3259_v15 = vld [vmem:[#allocation7 + $0x280] ss:$16 sps:$4 sm:$0xff]  }
  0xa2   :  { %1216 = vmatprep.subr.bf16.mxu0 %v3201_v6  ;;  %1298 = vmatprep.subr.bf16.mxu1 %v3204_v16  ;;  %v3262_v16 = vld [vmem:[#allocation7 + $0x288] ss:$16 sps:$4 sm:$0xff]  }
  0xa5   :  { %1217 = vmatpush1.bf16.msra.mxu0 %v3199_v9  ;;  %1299 = vmatpush1.bf16.msra.mxu1 %v3202_v19  ;;  %v3265_v19 = vld [vmem:[#allocation7 + $0x2a0] ss:$16 sps:$4 sm:$0xff]  }
  0xa6   :  { %1218 = vmatprep.subr.bf16.mxu0 %v3207_v10  ;;  %1300 = vmatprep.subr.bf16.mxu1 %v3210_v20  ;;  %v3268_v20 = vld [vmem:[#allocation7 + $0x2a8] ss:$16 sps:$4 sm:$0xff]  }
  0xa9   :  { %1219 = vmatpush1.bf16.msra.mxu0 %v3205_v13  ;;  %1301 = vmatpush1.bf16.msra.mxu1 %v3208_v22  ;;  %v3261_v13 = vld [vmem:[#allocation7 + $0x284] ss:$16 sps:$4 sm:$0xff]   ;;  %v3276_v22 = vld [vmem:[#allocation7 + $0x2cc] ss:$16 sps:$4 sm:$0xff]  }
  0xaa   :  { %1220 = vmatprep.subr.bf16.mxu0 %v3213_v14  ;;  %1302 = vmatprep.subr.bf16.mxu1 %v3216_v23  ;;  %v3264_v14 = vld [vmem:[#allocation7 + $0x28c] ss:$16 sps:$4 sm:$0xff]   ;;  %v3271_v23 = vld [vmem:[#allocation7 + $0x2c0] ss:$16 sps:$4 sm:$0xff]  }
  0xad   :  { %1221 = vmatpush1.bf16.msra.mxu0 %v3211_v17  ;;  %1303 = vmatpush1.bf16.msra.mxu1 %v3214_v24  ;;  %v3267_v17 = vld [vmem:[#allocation7 + $0x2a4] ss:$16 sps:$4 sm:$0xff]   ;;  %v3274_v24 = vld [vmem:[#allocation7 + $0x2c8] ss:$16 sps:$4 sm:$0xff]  }
  0xae   :  { %1222 = vmatprep.subr.bf16.mxu0 %v3219_v18  ;;  %1304 = vmatprep.subr.bf16.mxu1 %v3222_v25  ;;  %v3270_v18 = vld [vmem:[#allocation7 + $0x2ac] ss:$16 sps:$4 sm:$0xff]   ;;  %v3279_v25 = vld [vmem:[#allocation7 + $0x2e4] ss:$16 sps:$4 sm:$0xff]  }
  0xb1   :  { %1223 = vmatpush1.bf16.msra.mxu0 %v3217_v21  ;;  %1305 = vmatpush1.bf16.msra.mxu1 %v3220_v26  ;;  %v3273_v21 = vld [vmem:[#allocation7 + $0x2c4] ss:$16 sps:$4 sm:$0xff]   ;;  %v3282_v26 = vld [vmem:[#allocation7 + $0x2ec] ss:$16 sps:$4 sm:$0xff]  }
  0xb2   :  { %1224 = vmatprep.subr.bf16.mxu0 %v3225_v27  ;;  %1306 = vmatprep.subr.bf16.mxu1 %v3228_v28  ;;  %v3277_v27 = vld [vmem:[#allocation7 + $0x2e0] ss:$16 sps:$4 sm:$0xff]   ;;  %v3280_v28 = vld [vmem:[#allocation7 + $0x2e8] ss:$16 sps:$4 sm:$0xff]  }
  0xb5   :  { %1225 = vmatpush1.bf16.msra.mxu0 %v3223_v29  ;;  %1307 = vmatpush1.bf16.msra.mxu1 %v3226_v30  ;;  %v3285_v29 = vld [vmem:[#allocation7 + $0x304] ss:$16 sps:$4 sm:$0xff]   ;;  %v3288_v30 = vld [vmem:[#allocation7 + $0x30c] ss:$16 sps:$4 sm:$0xff]  }
  0xb6   :  { %1226 = vmatprep.subr.bf16.mxu0 %v3231_v31  ;;  %1308 = vmatprep.subr.bf16.mxu1 %v3234_v32  ;;  %v3283_v31 = vld [vmem:[#allocation7 + $0x300] ss:$16 sps:$4 sm:$0xff]   ;;  %v3286_v32 = vld [vmem:[#allocation7 + $0x308] ss:$16 sps:$4 sm:$0xff]  }
  0xb9   :  { %1227 = vmatpush1.bf16.msra.mxu0 %v3229_v33  ;;  %1309 = vmatpush1.bf16.msra.mxu1 %v3232_v34  ;;  %v3291_v33 = vld [vmem:[#allocation7 + $0x324] ss:$16 sps:$4 sm:$0xff]   ;;  %v3294_v34 = vld [vmem:[#allocation7 + $0x32c] ss:$16 sps:$4 sm:$0xff]  }
  0xba   :  { %1237 = vmatprep.subr.bf16.mxu0 %v3237_v35  ;;  %1319 = vmatprep.subr.bf16.mxu1 %v3240_v36  ;;  %v3289_v35 = vld [vmem:[#allocation7 + $0x320] ss:$16 sps:$4 sm:$0xff]   ;;  %v3292_v36 = vld [vmem:[#allocation7 + $0x328] ss:$16 sps:$4 sm:$0xff]  }
 0x14f   :  { %v350_v44 = vpop.f32.mrb[0].mxu0  ;;  %v3847_v0 = vpop.f32.mrb[0].mxu1 }
 0x150   :  { %v351_v45 = vadd.f32 %v350_v44, %v139_v42  ;;  %v352_v46 = vpop.f32.mrb[1].mxu0  ;;  %v393_v1 = vpop.f32.mrb[1].mxu1  ;;  %v3300_v42 = vld [vmem:[#allocation7 + $0x34c] ss:$16 sps:$4 sm:$0xff]   ;;  %v3298_v44 = vld [vmem:[#allocation7 + $0x348] ss:$16 sps:$4 sm:$0xff]  }
 0x151   :  { %v353_v47 = vadd.f32 %v352_v46, %v143_v43  ;;  %v354_v48 = vpop.f32.mrb[2].mxu0  ;;  %v394_v2 = vadd.f32 %v393_v1, %v151_v59  ;;  %v395_v3 = vpop.f32.mrb[2].mxu1  ;;  %v3295_v43 = vld [vmem:[#allocation7 + $0x340] ss:$16 sps:$4 sm:$0xff]   ;;  %v3306_v46 = vld [vmem:[#allocation7 + $0x36c] ss:$16 sps:$4 sm:$0xff]  }
 0x152   :  { %v398_v49 = vmax.f32 %v351_v45, 0.0  ;;  %v355_v50 = vpop.f32.mrb[3].mxu0  ;;  %v396_v6 = vpop.f32.mrb[3].mxu1  ;;  %v3303_v45 = vld [vmem:[#allocation7 + $0x364] ss:$16 sps:$4 sm:$0xff]  }
 0x153   :  { %v399_v51 = vmax.f32 %v353_v47, 0.0  ;;  %v401_v9 = vmax.f32 %v394_v2, 0.0  ;;  %v3301_v47 = vld [vmem:[#allocation7 + $0x360] ss:$16 sps:$4 sm:$0xff]   ;;  %v3304_v48 = vld [vmem:[#allocation7 + $0x368] ss:$16 sps:$4 sm:$0xff]  }
 0x154   :  { %v402_v56 = vpack.c.bf16 %v398_v49, %v398_v49  ;;  %v3309_v49 = vld [vmem:[#allocation7 + $0x384] ss:$16 sps:$4 sm:$0xff]   ;;  %v3312_v50 = vld [vmem:[#allocation7 + $0x38c] ss:$16 sps:$4 sm:$0xff]   ;;  %v3325_v3 = vld [vmem:[#allocation7 + $0x3e0] ss:$16 sps:$4 sm:$0xff]  }
 0x155   :  { %v403_v53 = vpack.c.bf16 %v399_v51, %v399_v51  ;;  %v405_v10 = vpack.c.bf16 %v401_v9, %v401_v9  ;;  %v3307_v51 = vld [vmem:[#allocation7 + $0x380] ss:$16 sps:$4 sm:$0xff]   ;;  %v3327_v1 = vld [vmem:[#allocation7 + $0x3e4] ss:$16 sps:$4 sm:$0xff]   ;;  %v3330_v2 = vld [vmem:[#allocation7 + $0x3ec] ss:$16 sps:$4 sm:$0xff]  }
 0x156   :  { %v3336_v6 = vld [vmem:[#allocation8 + $0xc] ss:$16 sps:$4 sm:$0xff]  }
 0x157   :  { %1228 = vmatprep.mubr.bf16.mxu0 %v403_v53  ;;  %1310 = vmatprep.mubr.bf16.mxu1 %v403_v53  ;;  %v3310_v53 = vld [vmem:[#allocation7 + $0x388] ss:$16 sps:$4 sm:$0xff]  }
 0x158   :  { %1229 = vmatmul.mubr.bf16.vlgmr.msra.gmra.mrb[4].mxu0 %v402_v56  ;;  %1311 = vmatmul.mubr.bf16.vlgmr.msra.gmra.mrb[4].mxu1 %v402_v56  ;;  %v3318_v56 = vld [vmem:[#allocation7 + $0x3ac] ss:$16 sps:$4 sm:$0xff]  }
 0x159   :  { %1238 = vmatpush1.bf16.msra.mxu0 %v3235_v54  ;;  %1320 = vmatpush1.bf16.msra.mxu1 %v3238_v55  ;;  %v3850_v54 = vsub.s32 2, %v3825_v38  ;;  %v3315_v55 = vld [vmem:[#allocation7 + $0x3a4] ss:$16 sps:$4 sm:$0xff]  }
 0x15a   :  { %1239 = vmatprep.subr.bf16.mxu0 %v3243_v57  ;;  %1321 = vmatprep.subr.bf16.mxu1 %v3246_v58  ;;  %v3313_v57 = vld [vmem:[#allocation7 + $0x3a0] ss:$16 sps:$4 sm:$0xff]   ;;  %v3316_v58 = vld [vmem:[#allocation7 + $0x3a8] ss:$16 sps:$4 sm:$0xff]  }
 0x15b   :  { %1269 = vmatprep.mubr.bf16.mxu0 %v405_v10  ;;  %1351 = vmatprep.mubr.bf16.mxu1 %v405_v10  ;;  %v147_v59 = vrot.slane %v3833_v40, %v3850_v54  ;;  %v3333_v40 = vld [vmem:[#allocation8 + $0x4] ss:$16 sps:$4 sm:$0xff]   ;;  %v3342_v10 = vld [vmem:[#allocation8 + $0x2c] ss:$16 sps:$4 sm:$0xff]  }
 0x15d   :  { %1240 = vmatpush1.bf16.msra.mxu0 %v3241_v60  ;;  %1322 = vmatpush1.bf16.msra.mxu1 %v3244_v61  ;;  %v3321_v60 = vld [vmem:[#allocation7 + $0x3c4] ss:$16 sps:$4 sm:$0xff]   ;;  %v3324_v61 = vld [vmem:[#allocation7 + $0x3cc] ss:$16 sps:$4 sm:$0xff]   ;;  %v392_v38 = vadd.f32 %v3847_v0, %v147_v59 }
 0x15e   :  { %1241 = vmatprep.subr.bf16.mxu0 %v3249_v62  ;;  %1323 = vmatprep.subr.bf16.mxu1 %v3252_v63  ;;  %v3319_v62 = vld [vmem:[#allocation7 + $0x3c0] ss:$16 sps:$4 sm:$0xff]   ;;  %v3322_v63 = vld [vmem:[#allocation7 + $0x3c8] ss:$16 sps:$4 sm:$0xff]   ;;  %v3339_v0 = vld [vmem:[#allocation8 + $0x24] ss:$16 sps:$4 sm:$0xff]  }
 0x15f   :  { %v3405_v59 = vld [vmem:[#allocation8 + $0x184] ss:$16 sps:$4 sm:$0xff]  }
 0x161   :  { %1242 = vmatpush1.bf16.msra.mxu0 %v3247_v4  ;;  %1324 = vmatpush1.bf16.msra.mxu1 %v3250_v5  ;;  %v3328_v4 = vld [vmem:[#allocation7 + $0x3e8] ss:$16 sps:$4 sm:$0xff]   ;;  %v400_v5 = vmax.f32 %v392_v38, 0.0  ;;  %v3414_v38 = vld [vmem:[#allocation8 + $0x1ac] ss:$16 sps:$4 sm:$0xff]  }
 0x162   :  { %1243 = vmatprep.subr.bf16.mxu0 %v3255_v7  ;;  %1325 = vmatprep.subr.bf16.mxu1 %v3258_v8  ;;  %v3331_v7 = vld [vmem:[#allocation8] ss:$16 sps:$4 sm:$0xff]   ;;  %v3334_v8 = vld [vmem:[#allocation8 + $0x8] ss:$16 sps:$4 sm:$0xff]  }
 0x163   :  { %v404_v9 = vpack.c.bf16 %v400_v5, %v400_v5  ;;  %v3415_v5 = vld [vmem:[#allocation8 + $0x1c0] ss:$16 sps:$4 sm:$0xff]  }
 0x165   :  { %1244 = vmatpush1.bf16.msra.mxu0 %v3253_v11  ;;  %1326 = vmatpush1.bf16.msra.mxu1 %v3256_v12  ;;  %v3337_v11 = vld [vmem:[#allocation8 + $0x20] ss:$16 sps:$4 sm:$0xff]   ;;  %v3340_v12 = vld [vmem:[#allocation8 + $0x28] ss:$16 sps:$4 sm:$0xff]  }
 0x166   :  { %1245 = vmatprep.subr.bf16.mxu0 %v3261_v13  ;;  %1327 = vmatprep.subr.bf16.mxu1 %v3264_v14  ;;  %v3345_v13 = vld [vmem:[#allocation8 + $0x44] ss:$16 sps:$4 sm:$0xff]   ;;  %v3348_v14 = vld [vmem:[#allocation8 + $0x4c] ss:$16 sps:$4 sm:$0xff]  }
 0x169   :  { %1246 = vmatpush1.bf16.msra.mxu0 %v3259_v15  ;;  %1328 = vmatpush1.bf16.msra.mxu1 %v3262_v16  ;;  %v3343_v15 = vld [vmem:[#allocation8 + $0x40] ss:$16 sps:$4 sm:$0xff]   ;;  %v3346_v16 = vld [vmem:[#allocation8 + $0x48] ss:$16 sps:$4 sm:$0xff]  }
 0x16a   :  { %1247 = vmatprep.subr.bf16.mxu0 %v3267_v17  ;;  %1329 = vmatprep.subr.bf16.mxu1 %v3270_v18  ;;  %v3351_v17 = vld [vmem:[#allocation8 + $0x64] ss:$16 sps:$4 sm:$0xff]   ;;  %v3354_v18 = vld [vmem:[#allocation8 + $0x6c] ss:$16 sps:$4 sm:$0xff]  }
 0x16d   :  { %1248 = vmatpush1.bf16.msra.mxu0 %v3265_v19  ;;  %1330 = vmatpush1.bf16.msra.mxu1 %v3268_v20  ;;  %v3349_v19 = vld [vmem:[#allocation8 + $0x60] ss:$16 sps:$4 sm:$0xff]   ;;  %v3352_v20 = vld [vmem:[#allocation8 + $0x68] ss:$16 sps:$4 sm:$0xff]  }
 0x16e   :  { %1249 = vmatprep.subr.bf16.mxu0 %v3273_v21  ;;  %1331 = vmatprep.subr.bf16.mxu1 %v3276_v22  ;;  %v3357_v21 = vld [vmem:[#allocation8 + $0x84] ss:$16 sps:$4 sm:$0xff]   ;;  %v3360_v22 = vld [vmem:[#allocation8 + $0x8c] ss:$16 sps:$4 sm:$0xff]  }
 0x171   :  { %1250 = vmatpush1.bf16.msra.mxu0 %v3271_v23  ;;  %1332 = vmatpush1.bf16.msra.mxu1 %v3274_v24  ;;  %v3355_v23 = vld [vmem:[#allocation8 + $0x80] ss:$16 sps:$4 sm:$0xff]   ;;  %v3358_v24 = vld [vmem:[#allocation8 + $0x88] ss:$16 sps:$4 sm:$0xff]  }
 0x172   :  { %1251 = vmatprep.subr.bf16.mxu0 %v3279_v25  ;;  %1333 = vmatprep.subr.bf16.mxu1 %v3282_v26  ;;  %v3363_v25 = vld [vmem:[#allocation8 + $0xa4] ss:$16 sps:$4 sm:$0xff]   ;;  %v3366_v26 = vld [vmem:[#allocation8 + $0xac] ss:$16 sps:$4 sm:$0xff]  }
 0x175   :  { %1252 = vmatpush1.bf16.msra.mxu0 %v3277_v27  ;;  %1334 = vmatpush1.bf16.msra.mxu1 %v3280_v28  ;;  %v3361_v27 = vld [vmem:[#allocation8 + $0xa0] ss:$16 sps:$4 sm:$0xff]   ;;  %v3364_v28 = vld [vmem:[#allocation8 + $0xa8] ss:$16 sps:$4 sm:$0xff]  }
 0x176   :  { %1253 = vmatprep.subr.bf16.mxu0 %v3285_v29  ;;  %1335 = vmatprep.subr.bf16.mxu1 %v3288_v30  ;;  %v3369_v29 = vld [vmem:[#allocation8 + $0xc4] ss:$16 sps:$4 sm:$0xff]   ;;  %v3372_v30 = vld [vmem:[#allocation8 + $0xcc] ss:$16 sps:$4 sm:$0xff]  }
 0x179   :  { %1254 = vmatpush1.bf16.msra.mxu0 %v3283_v31  ;;  %1336 = vmatpush1.bf16.msra.mxu1 %v3286_v32  ;;  %v3367_v31 = vld [vmem:[#allocation8 + $0xc0] ss:$16 sps:$4 sm:$0xff]   ;;  %v3370_v32 = vld [vmem:[#allocation8 + $0xc8] ss:$16 sps:$4 sm:$0xff]  }
 0x17a   :  { %1255 = vmatprep.subr.bf16.mxu0 %v3291_v33  ;;  %1337 = vmatprep.subr.bf16.mxu1 %v3294_v34  ;;  %v3375_v33 = vld [vmem:[#allocation8 + $0xe4] ss:$16 sps:$4 sm:$0xff]   ;;  %v3378_v34 = vld [vmem:[#allocation8 + $0xec] ss:$16 sps:$4 sm:$0xff]  }
 0x17d   :  { %1256 = vmatpush1.bf16.msra.mxu0 %v3289_v35  ;;  %1338 = vmatpush1.bf16.msra.mxu1 %v3292_v36  ;;  %v3373_v35 = vld [vmem:[#allocation8 + $0xe0] ss:$16 sps:$4 sm:$0xff]   ;;  %v3376_v36 = vld [vmem:[#allocation8 + $0xe8] ss:$16 sps:$4 sm:$0xff]  }
 0x17e   :  { %1257 = vmatprep.subr.bf16.mxu0 %v3297_v37  ;;  %1339 = vmatprep.subr.bf16.mxu1 %v3300_v42  ;;  %v3381_v37 = vld [vmem:[#allocation8 + $0x104] ss:$16 sps:$4 sm:$0xff]   ;;  %v3384_v42 = vld [vmem:[#allocation8 + $0x10c] ss:$16 sps:$4 sm:$0xff]  }
 0x181   :  { %1258 = vmatpush1.bf16.msra.mxu0 %v3295_v43  ;;  %1340 = vmatpush1.bf16.msra.mxu1 %v3298_v44  ;;  %v3379_v43 = vld [vmem:[#allocation8 + $0x100] ss:$16 sps:$4 sm:$0xff]   ;;  %v3382_v44 = vld [vmem:[#allocation8 + $0x108] ss:$16 sps:$4 sm:$0xff]  }
 0x182   :  { %1259 = vmatprep.subr.bf16.mxu0 %v3303_v45  ;;  %1341 = vmatprep.subr.bf16.mxu1 %v3306_v46  ;;  %v3387_v45 = vld [vmem:[#allocation8 + $0x124] ss:$16 sps:$4 sm:$0xff]   ;;  %v3390_v46 = vld [vmem:[#allocation8 + $0x12c] ss:$16 sps:$4 sm:$0xff]  }
 0x185   :  { %1260 = vmatpush1.bf16.msra.mxu0 %v3301_v47  ;;  %1342 = vmatpush1.bf16.msra.mxu1 %v3304_v48  ;;  %v3385_v47 = vld [vmem:[#allocation8 + $0x120] ss:$16 sps:$4 sm:$0xff]   ;;  %v3388_v48 = vld [vmem:[#allocation8 + $0x128] ss:$16 sps:$4 sm:$0xff]  }
 0x186   :  { %1261 = vmatprep.subr.bf16.mxu0 %v3309_v49  ;;  %1343 = vmatprep.subr.bf16.mxu1 %v3312_v50  ;;  %v3393_v49 = vld [vmem:[#allocation8 + $0x144] ss:$16 sps:$4 sm:$0xff]   ;;  %v3396_v50 = vld [vmem:[#allocation8 + $0x14c] ss:$16 sps:$4 sm:$0xff]  }
 0x189   :  { %1262 = vmatpush1.bf16.msra.mxu0 %v3307_v51  ;;  %1344 = vmatpush1.bf16.msra.mxu1 %v3310_v53  ;;  %v3391_v51 = vld [vmem:[#allocation8 + $0x140] ss:$16 sps:$4 sm:$0xff]   ;;  %v3394_v53 = vld [vmem:[#allocation8 + $0x148] ss:$16 sps:$4 sm:$0xff]  }
 0x18a   :  { %1263 = vmatprep.subr.bf16.mxu0 %v3315_v55  ;;  %1345 = vmatprep.subr.bf16.mxu1 %v3318_v56  ;;  %v3399_v55 = vld [vmem:[#allocation8 + $0x164] ss:$16 sps:$4 sm:$0xff]   ;;  %v3402_v56 = vld [vmem:[#allocation8 + $0x16c] ss:$16 sps:$4 sm:$0xff]  }
 0x18d   :  { %1264 = vmatpush1.bf16.msra.mxu0 %v3313_v57  ;;  %1346 = vmatpush1.bf16.msra.mxu1 %v3316_v58  ;;  %v3397_v57 = vld [vmem:[#allocation8 + $0x160] ss:$16 sps:$4 sm:$0xff]   ;;  %v3400_v58 = vld [vmem:[#allocation8 + $0x168] ss:$16 sps:$4 sm:$0xff]  }
 0x18e   :  { %1265 = vmatprep.subr.bf16.mxu0 %v3321_v60  ;;  %1347 = vmatprep.subr.bf16.mxu1 %v3324_v61  ;;  %v3408_v60 = vld [vmem:[#allocation8 + $0x18c] ss:$16 sps:$4 sm:$0xff]   ;;  %v3403_v61 = vld [vmem:[#allocation8 + $0x180] ss:$16 sps:$4 sm:$0xff]  }
 0x191   :  { %1266 = vmatpush1.bf16.msra.mxu0 %v3319_v62  ;;  %1348 = vmatpush1.bf16.msra.mxu1 %v3322_v63  ;;  %v3406_v62 = vld [vmem:[#allocation8 + $0x188] ss:$16 sps:$4 sm:$0xff]   ;;  %v3411_v63 = vld [vmem:[#allocation8 + $0x1a4] ss:$16 sps:$4 sm:$0xff]  }
 0x192   :  { %1267 = vmatprep.subr.bf16.mxu0 %v3327_v1  ;;  %1349 = vmatprep.subr.bf16.mxu1 %v3330_v2  ;;  %v3409_v1 = vld [vmem:[#allocation8 + $0x1a0] ss:$16 sps:$4 sm:$0xff]   ;;  %v3412_v2 = vld [vmem:[#allocation8 + $0x1a8] ss:$16 sps:$4 sm:$0xff]  }
 0x195   :  { %1268 = vmatpush1.bf16.msra.mxu0 %v3325_v3  ;;  %1350 = vmatpush1.bf16.msra.mxu1 %v3328_v4  ;;  %v3417_v3 = vld [vmem:[#allocation8 + $0x1c4] ss:$16 sps:$4 sm:$0xff]   ;;  %v3420_v4 = vld [vmem:[#allocation8 + $0x1cc] ss:$16 sps:$4 sm:$0xff]  }
 0x196   :  { %2158 = vmatprep.subr.bf16.mxu0 %v3333_v40  ;;  %2240 = vmatprep.subr.bf16.mxu1 %v3336_v6  ;;  %v3418_v40 = vld [vmem:[#allocation8 + $0x1c8] ss:$16 sps:$4 sm:$0xff]   ;;  %v3423_v6 = vld [vmem:[#allocation8 + $0x1e4] ss:$16 sps:$4 sm:$0xff]  }
 0x198   :  { %1270 = vmatmul.mubr.bf16.vlgmr.msra.gmra.mrb[4].mxu0 %v404_v9  ;;  %1352 = vmatmul.mubr.bf16.vlgmr.msra.gmra.mrb[4].mxu1 %v404_v9  ;;  %v3424_v9 = vld [vmem:[#allocation8 + $0x1e8] ss:$16 sps:$4 sm:$0xff]  }
 0x199   :  { %2159 = vmatpush1.bf16.msra.mxu0 %v3331_v7  ;;  %2241 = vmatpush1.bf16.msra.mxu1 %v3334_v8  ;;  %v3426_v7 = vld [vmem:[#allocation8 + $0x1ec] ss:$16 sps:$4 sm:$0xff]   ;;  %v3421_v8 = vld [vmem:[#allocation8 + $0x1e0] ss:$16 sps:$4 sm:$0xff]  }
 0x19a   :  { %2160 = vmatprep.subr.bf16.mxu0 %v3339_v0  ;;  %2242 = vmatprep.subr.bf16.mxu1 %v3342_v10  ;;  %v3429_v0 = vld [vmem:[#allocation8 + $0x204] ss:$16 sps:$4 sm:$0xff]   ;;  %v3432_v10 = vld [vmem:[#allocation8 + $0x20c] ss:$16 sps:$4 sm:$0xff]  }
 0x19d   :  { %2161 = vmatpush1.bf16.msra.mxu0 %v3337_v11  ;;  %2243 = vmatpush1.bf16.msra.mxu1 %v3340_v12  ;;  %v3858_v11 = vld [vmem:[%s3897_s4] sm:$0xf] }
 0x19e   :  { %2162 = vmatprep.subr.bf16.mxu0 %v3345_v13  ;;  %2244 = vmatprep.subr.bf16.mxu1 %v3348_v14  ;;  %v539_v12 = vrot.slane %v3858_v11, %v3828_v39  ;;  %v543_v13 = vrot.slane %v3858_v11, %v3836_v41  ;;  %v551_v14 = vrot.slane %v3858_v11, %v3843_v52 }
 0x1a1   :  { %2163 = vmatpush1.bf16.msra.mxu0 %v3343_v15  ;;  %2245 = vmatpush1.bf16.msra.mxu1 %v3346_v16 }
 0x1a2   :  { %2164 = vmatprep.subr.bf16.mxu0 %v3351_v17  ;;  %2246 = vmatprep.subr.bf16.mxu1 %v3354_v18 }
 0x1a5   :  { %2165 = vmatpush1.bf16.msra.mxu0 %v3349_v19  ;;  %2247 = vmatpush1.bf16.msra.mxu1 %v3352_v20 }
 0x1a6   :  { %2166 = vmatprep.subr.bf16.mxu0 %v3357_v21  ;;  %2248 = vmatprep.subr.bf16.mxu1 %v3360_v22 }
 0x1a9   :  { %2167 = vmatpush1.bf16.msra.mxu0 %v3355_v23  ;;  %2249 = vmatpush1.bf16.msra.mxu1 %v3358_v24 }
 0x1aa   :  { %2168 = vmatprep.subr.bf16.mxu0 %v3363_v25  ;;  %2250 = vmatprep.subr.bf16.mxu1 %v3366_v26 }
 0x1ad   :  { %2169 = vmatpush1.bf16.msra.mxu0 %v3361_v27  ;;  %2251 = vmatpush1.bf16.msra.mxu1 %v3364_v28 }
 0x1ae   :  { %2170 = vmatprep.subr.bf16.mxu0 %v3369_v29  ;;  %2252 = vmatprep.subr.bf16.mxu1 %v3372_v30  ;;  %v3427_v30 = vld [vmem:[#allocation8 + $0x200] ss:$16 sps:$4 sm:$0xff]  }
 0x1b1   :  { %2171 = vmatpush1.bf16.msra.mxu0 %v3367_v31  ;;  %2253 = vmatpush1.bf16.msra.mxu1 %v3370_v32  ;;  %v3430_v31 = vld [vmem:[#allocation8 + $0x208] ss:$16 sps:$4 sm:$0xff]  }
 0x1b2   :  { %2172 = vmatprep.subr.bf16.mxu0 %v3375_v33  ;;  %2254 = vmatprep.subr.bf16.mxu1 %v3378_v34  ;;  %v3435_v33 = vld [vmem:[#allocation8 + $0x224] ss:$16 sps:$4 sm:$0xff]   ;;  %v3438_v34 = vld [vmem:[#allocation8 + $0x22c] ss:$16 sps:$4 sm:$0xff]  }
 0x1b5   :  { %2173 = vmatpush1.bf16.msra.mxu0 %v3373_v35  ;;  %2255 = vmatpush1.bf16.msra.mxu1 %v3376_v36  ;;  %v3433_v36 = vld [vmem:[#allocation8 + $0x220] ss:$16 sps:$4 sm:$0xff]  }
 0x1b6   :  { %2174 = vmatprep.subr.bf16.mxu0 %v3381_v37  ;;  %2256 = vmatprep.subr.bf16.mxu1 %v3384_v42  ;;  %v3436_v37 = vld [vmem:[#allocation8 + $0x228] ss:$16 sps:$4 sm:$0xff]   ;;  %v3441_v42 = vld [vmem:[#allocation8 + $0x244] ss:$16 sps:$4 sm:$0xff]  }
 0x1b9   :  { %2175 = vmatpush1.bf16.msra.mxu0 %v3379_v43  ;;  %2257 = vmatpush1.bf16.msra.mxu1 %v3382_v44  ;;  %v3444_v43 = vld [vmem:[#allocation8 + $0x24c] ss:$16 sps:$4 sm:$0xff]   ;;  %v3439_v44 = vld [vmem:[#allocation8 + $0x240] ss:$16 sps:$4 sm:$0xff]  }
 0x1ba   :  { %2176 = vmatprep.subr.bf16.mxu0 %v3387_v45  ;;  %2258 = vmatprep.subr.bf16.mxu1 %v3390_v46  ;;  %v3442_v45 = vld [vmem:[#allocation8 + $0x248] ss:$16 sps:$4 sm:$0xff]   ;;  %v3447_v46 = vld [vmem:[#allocation8 + $0x264] ss:$16 sps:$4 sm:$0xff]  }
 0x1bd   :  { %2177 = vmatpush1.bf16.msra.mxu0 %v3385_v47  ;;  %2259 = vmatpush1.bf16.msra.mxu1 %v3388_v48  ;;  %v3450_v47 = vld [vmem:[#allocation8 + $0x26c] ss:$16 sps:$4 sm:$0xff]   ;;  %v3445_v48 = vld [vmem:[#allocation8 + $0x260] ss:$16 sps:$4 sm:$0xff]  }
 0x1be   :  { %2178 = vmatprep.subr.bf16.mxu0 %v3393_v49  ;;  %2260 = vmatprep.subr.bf16.mxu1 %v3396_v50  ;;  %v3448_v49 = vld [vmem:[#allocation8 + $0x268] ss:$16 sps:$4 sm:$0xff]   ;;  %v3453_v50 = vld [vmem:[#allocation8 + $0x284] ss:$16 sps:$4 sm:$0xff]  }
 0x1c1   :  { %2179 = vmatpush1.bf16.msra.mxu0 %v3391_v51  ;;  %2261 = vmatpush1.bf16.msra.mxu1 %v3394_v53  ;;  %v3456_v51 = vld [vmem:[#allocation8 + $0x28c] ss:$16 sps:$4 sm:$0xff]   ;;  %v3451_v53 = vld [vmem:[#allocation8 + $0x280] ss:$16 sps:$4 sm:$0xff]  }
 0x1c2   :  { %2180 = vmatprep.subr.bf16.mxu0 %v3399_v55  ;;  %2262 = vmatprep.subr.bf16.mxu1 %v3402_v56  ;;  %v3454_v55 = vld [vmem:[#allocation8 + $0x288] ss:$16 sps:$4 sm:$0xff]   ;;  %v3459_v56 = vld [vmem:[#allocation8 + $0x2a4] ss:$16 sps:$4 sm:$0xff]  }
 0x1c5   :  { %2181 = vmatpush1.bf16.msra.mxu0 %v3397_v57  ;;  %2263 = vmatpush1.bf16.msra.mxu1 %v3400_v58  ;;  %v3462_v57 = vld [vmem:[#allocation8 + $0x2ac] ss:$16 sps:$4 sm:$0xff]   ;;  %v3457_v58 = vld [vmem:[#allocation8 + $0x2a0] ss:$16 sps:$4 sm:$0xff]  }
 0x1c6   :  { %2182 = vmatprep.subr.bf16.mxu0 %v3405_v59  ;;  %2264 = vmatprep.subr.bf16.mxu1 %v3408_v60  ;;  %v3460_v59 = vld [vmem:[#allocation8 + $0x2a8] ss:$16 sps:$4 sm:$0xff]   ;;  %v3465_v60 = vld [vmem:[#allocation8 + $0x2c4] ss:$16 sps:$4 sm:$0xff]  }
 0x1c9   :  { %2183 = vmatpush1.bf16.msra.mxu0 %v3403_v61  ;;  %2265 = vmatpush1.bf16.msra.mxu1 %v3406_v62  ;;  %v3468_v61 = vld [vmem:[#allocation8 + $0x2cc] ss:$16 sps:$4 sm:$0xff]   ;;  %v3463_v62 = vld [vmem:[#allocation8 + $0x2c0] ss:$16 sps:$4 sm:$0xff]  }
 0x1ca   :  { %2184 = vmatprep.subr.bf16.mxu0 %v3411_v63  ;;  %2266 = vmatprep.subr.bf16.mxu1 %v3414_v38  ;;  %v3466_v63 = vld [vmem:[#allocation8 + $0x2c8] ss:$16 sps:$4 sm:$0xff]   ;;  %v3471_v38 = vld [vmem:[#allocation8 + $0x2e4] ss:$16 sps:$4 sm:$0xff]  }
 0x1cd   :  { %2185 = vmatpush1.bf16.msra.mxu0 %v3409_v1  ;;  %2267 = vmatpush1.bf16.msra.mxu1 %v3412_v2  ;;  %v3474_v1 = vld [vmem:[#allocation8 + $0x2ec] ss:$16 sps:$4 sm:$0xff]   ;;  %v3469_v2 = vld [vmem:[#allocation8 + $0x2e0] ss:$16 sps:$4 sm:$0xff]  }
 0x1ce   :  { %2186 = vmatprep.subr.bf16.mxu0 %v3417_v3  ;;  %2268 = vmatprep.subr.bf16.mxu1 %v3420_v4  ;;  %v3472_v3 = vld [vmem:[#allocation8 + $0x2e8] ss:$16 sps:$4 sm:$0xff]   ;;  %v3477_v4 = vld [vmem:[#allocation8 + $0x304] ss:$16 sps:$4 sm:$0xff]  }
 0x1d1   :  { %2187 = vmatpush1.bf16.msra.mxu0 %v3415_v5  ;;  %2269 = vmatpush1.bf16.msra.mxu1 %v3418_v40  ;;  %v3480_v5 = vld [vmem:[#allocation8 + $0x30c] ss:$16 sps:$4 sm:$0xff]   ;;  %v3475_v40 = vld [vmem:[#allocation8 + $0x300] ss:$16 sps:$4 sm:$0xff]  }
 0x1d2   :  { %2188 = vmatprep.subr.bf16.mxu0 %v3423_v6  ;;  %2270 = vmatprep.subr.bf16.mxu1 %v3426_v7  ;;  %v3478_v6 = vld [vmem:[#allocation8 + $0x308] ss:$16 sps:$4 sm:$0xff]   ;;  %v3483_v7 = vld [vmem:[#allocation8 + $0x324] ss:$16 sps:$4 sm:$0xff]  }
 0x1d5   :  { %2189 = vmatpush1.bf16.msra.mxu0 %v3421_v8  ;;  %2271 = vmatpush1.bf16.msra.mxu1 %v3424_v9  ;;  %v3486_v8 = vld [vmem:[#allocation8 + $0x32c] ss:$16 sps:$4 sm:$0xff]   ;;  %v3481_v9 = vld [vmem:[#allocation8 + $0x320] ss:$16 sps:$4 sm:$0xff]  }
 0x1d6   :  { %2199 = vmatprep.subr.bf16.mxu0 %v3429_v0  ;;  %2281 = vmatprep.subr.bf16.mxu1 %v3432_v10  ;;  %v3484_v0 = vld [vmem:[#allocation8 + $0x328] ss:$16 sps:$4 sm:$0xff]   ;;  %v3489_v10 = vld [vmem:[#allocation8 + $0x344] ss:$16 sps:$4 sm:$0xff]  }
 0x26b   :  { %v1271_v15 = vpop.f32.mrb[4].mxu0  ;;  %v3866_v16 = vpop.f32.mrb[4].mxu1 }
 0x26c   :  { %v3056_v17 = vadd.f32 %v1271_v15, %v539_v12  ;;  %v1273_v18 = vpop.f32.mrb[5].mxu0  ;;  %v1355_v19 = vpop.f32.mrb[5].mxu1  ;;  %v3492_v12 = vld [vmem:[#allocation8 + $0x34c] ss:$16 sps:$4 sm:$0xff]   ;;  %v3495_v15 = vld [vmem:[#allocation8 + $0x364] ss:$16 sps:$4 sm:$0xff]  }
 0x26d   :  { %v3057_v20 = vadd.f32 %v1273_v18, %v543_v13  ;;  %v3059_v21 = vadd.f32 %v1355_v19, %v551_v14  ;;  %v1275_v22 = vpop.f32.mrb[6].mxu0  ;;  %v1357_v23 = vpop.f32.mrb[6].mxu1  ;;  %v3487_v13 = vld [vmem:[#allocation8 + $0x340] ss:$16 sps:$4 sm:$0xff]   ;;  %v3490_v14 = vld [vmem:[#allocation8 + $0x348] ss:$16 sps:$4 sm:$0xff]  }
 0x26e   :  { %v1360_v24 = vmax.f32 %v3056_v17, 0.0  ;;  %v1276_v25 = vpop.f32.mrb[7].mxu0  ;;  %v1358_v26 = vpop.f32.mrb[7].mxu1  ;;  %v3498_v17 = vld [vmem:[#allocation8 + $0x36c] ss:$16 sps:$4 sm:$0xff]  }
 0x26f   :  { %v1361_v27 = vmax.f32 %v3057_v20, 0.0  ;;  %v1363_v28 = vmax.f32 %v3059_v21, 0.0  ;;  %v3493_v18 = vld [vmem:[#allocation8 + $0x360] ss:$16 sps:$4 sm:$0xff]   ;;  %v3496_v19 = vld [vmem:[#allocation8 + $0x368] ss:$16 sps:$4 sm:$0xff]  }
 0x270   :  { %v1364_v32 = vpack.c.bf16 %v1360_v24, %v1360_v24  ;;  %v3501_v20 = vld [vmem:[#allocation8 + $0x384] ss:$16 sps:$4 sm:$0xff]   ;;  %v3504_v21 = vld [vmem:[#allocation8 + $0x38c] ss:$16 sps:$4 sm:$0xff]   ;;  %v3499_v22 = vld [vmem:[#allocation8 + $0x380] ss:$16 sps:$4 sm:$0xff]  }
 0x271   :  { %v1365_v29 = vpack.c.bf16 %v1361_v27, %v1361_v27  ;;  %v1367_v35 = vpack.c.bf16 %v1363_v28, %v1363_v28  ;;  %v3502_v23 = vld [vmem:[#allocation8 + $0x388] ss:$16 sps:$4 sm:$0xff]   ;;  %v3507_v24 = vld [vmem:[#allocation8 + $0x3a4] ss:$16 sps:$4 sm:$0xff]   ;;  %v3510_v25 = vld [vmem:[#allocation8 + $0x3ac] ss:$16 sps:$4 sm:$0xff]   ;;  %v547_v28 = vrot.slane %v3858_v11, %v3850_v54 }
 0x272   :  { %v3505_v26 = vld [vmem:[#allocation8 + $0x3a0] ss:$16 sps:$4 sm:$0xff]   ;;  %v3508_v27 = vld [vmem:[#allocation8 + $0x3a8] ss:$16 sps:$4 sm:$0xff]  }
 0x273   :  { %2190 = vmatprep.mubr.bf16.mxu0 %v1365_v29  ;;  %2272 = vmatprep.mubr.bf16.mxu1 %v1365_v29  ;;  %v3513_v29 = vld [vmem:[#allocation8 + $0x3c4] ss:$16 sps:$4 sm:$0xff]  }
 0x274   :  { %2191 = vmatmul.mubr.bf16.vlgmr.msra.gmra.mrb[8].mxu0 %v1364_v32  ;;  %2273 = vmatmul.mubr.bf16.vlgmr.msra.gmra.mrb[8].mxu1 %v1364_v32  ;;  %v3514_v32 = vld [vmem:[#allocation8 + $0x3c8] ss:$16 sps:$4 sm:$0xff]   ;;  %v3523_v11 = vld [vmem:[#allocation10 + $0x40] sm:$0xff]  }
 0x275   :  { %2200 = vmatpush1.bf16.msra.mxu0 %v3427_v30  ;;  %2282 = vmatpush1.bf16.msra.mxu1 %v3430_v31  ;;  %v3516_v30 = vld [vmem:[#allocation8 + $0x3cc] ss:$16 sps:$4 sm:$0xff]   ;;  %v3511_v31 = vld [vmem:[#allocation8 + $0x3c0] ss:$16 sps:$4 sm:$0xff]  }
 0x276   :  { %2231 = vmatprep.mubr.bf16.mxu0 %v1367_v35  ;;  %2313 = vmatprep.mubr.bf16.mxu1 %v1367_v35  ;;  %v3522_v35 = vld [vmem:[#allocation8 + $0x3ec] ss:$16 sps:$4 sm:$0xff]  }
 0x277   :  { %2201 = vmatprep.subr.bf16.mxu0 %v3435_v33  ;;  %2283 = vmatprep.subr.bf16.mxu1 %v3438_v34  ;;  %v3058_v33 = vadd.f32 %v3866_v16, %v547_v28  ;;  %v3519_v34 = vld [vmem:[#allocation8 + $0x3e4] ss:$16 sps:$4 sm:$0xff]   ;;  %v3527_v16 = vld [vmem:[#allocation10 + $0x48] sm:$0xff]  }
 0x279   :  { %2202 = vmatpush1.bf16.msra.mxu0 %v3433_v36  ;;  %2284 = vmatpush1.bf16.msra.mxu1 %v3436_v37  ;;  %v3517_v36 = vld [vmem:[#allocation8 + $0x3e0] ss:$16 sps:$4 sm:$0xff]   ;;  %v3520_v37 = vld [vmem:[#allocation8 + $0x3e8] ss:$16 sps:$4 sm:$0xff]  }
 0x27a   :  { %2203 = vmatprep.subr.bf16.mxu0 %v3441_v42  ;;  %2285 = vmatprep.subr.bf16.mxu1 %v3444_v43  ;;  %v1362_v42 = vmax.f32 %v3058_v33, 0.0  ;;  %v3524_v43 = vld [vmem:[#allocation10 + $0xc0] sm:$0xff]  }
 0x27d   :  { %2204 = vmatpush1.bf16.msra.mxu0 %v3439_v44  ;;  %2286 = vmatpush1.bf16.msra.mxu1 %v3442_v45  ;;  %v3525_v44 = vld [vmem:[#allocation10] sm:$0xff]  }
 0x27e   :  { %2205 = vmatprep.subr.bf16.mxu0 %v3447_v46  ;;  %2287 = vmatprep.subr.bf16.mxu1 %v3450_v47  ;;  %v3526_v45 = vld [vmem:[#allocation10 + $0x80] sm:$0xff]   ;;  %v1366_v46 = vpack.c.bf16 %v1362_v42, %v1362_v42  ;;  %v3528_v47 = vld [vmem:[#allocation10 + $0xc8] sm:$0xff]  }
 0x281   :  { %2206 = vmatpush1.bf16.msra.mxu0 %v3445_v48  ;;  %2288 = vmatpush1.bf16.msra.mxu1 %v3448_v49  ;;  %v3529_v48 = vld [vmem:[#allocation10 + $0x8] sm:$0xff]  }
 0x282   :  { %2207 = vmatprep.subr.bf16.mxu0 %v3453_v50  ;;  %2289 = vmatprep.subr.bf16.mxu1 %v3456_v51  ;;  %v3530_v49 = vld [vmem:[#allocation10 + $0x88] sm:$0xff]   ;;  %v3531_v50 = vld [vmem:[#allocation10 + $0x50] sm:$0xff]  }
 0x283   :  { %v3532_v51 = vld [vmem:[#allocation10 + $0xd0] sm:$0xff]  }
 0x285   :  { %2208 = vmatpush1.bf16.msra.mxu0 %v3451_v53  ;;  %2290 = vmatpush1.bf16.msra.mxu1 %v3454_v55  ;;  %v3533_v53 = vld [vmem:[#allocation10 + $0x10] sm:$0xff]  }
 0x286   :  { %2209 = vmatprep.subr.bf16.mxu0 %v3459_v56  ;;  %2291 = vmatprep.subr.bf16.mxu1 %v3462_v57  ;;  %v3534_v55 = vld [vmem:[#allocation10 + $0x90] sm:$0xff]   ;;  %v3535_v56 = vld [vmem:[#allocation10 + $0x58] sm:$0xff]  }
 0x287   :  { %v3536_v57 = vld [vmem:[#allocation10 + $0xd8] sm:$0xff]  }
 0x289   :  { %2210 = vmatpush1.bf16.msra.mxu0 %v3457_v58  ;;  %2292 = vmatpush1.bf16.msra.mxu1 %v3460_v59  ;;  %v3537_v58 = vld [vmem:[#allocation10 + $0x18] sm:$0xff]  }
 0x28a   :  { %2211 = vmatprep.subr.bf16.mxu0 %v3465_v60  ;;  %2293 = vmatprep.subr.bf16.mxu1 %v3468_v61  ;;  %v3538_v59 = vld [vmem:[#allocation10 + $0x98] sm:$0xff]   ;;  %v3539_v60 = vld [vmem:[#allocation10 + $0x60] sm:$0xff]  }
 0x28b   :  { %v3540_v61 = vld [vmem:[#allocation10 + $0xe0] sm:$0xff]  }
 0x28d   :  { %2212 = vmatpush1.bf16.msra.mxu0 %v3463_v62  ;;  %2294 = vmatpush1.bf16.msra.mxu1 %v3466_v63  ;;  %v3541_v62 = vld [vmem:[#allocation10 + $0x20] sm:$0xff]  }
 0x28e   :  { %2213 = vmatprep.subr.bf16.mxu0 %v3471_v38  ;;  %2295 = vmatprep.subr.bf16.mxu1 %v3474_v1  ;;  %v3542_v63 = vld [vmem:[#allocation10 + $0xa0] sm:$0xff]   ;;  %v3543_v38 = vld [vmem:[#allocation10 + $0x68] sm:$0xff]  }
 0x28f   :  { %v3544_v1 = vld [vmem:[#allocation10 + $0xe8] sm:$0xff]  }
 0x291   :  { %2214 = vmatpush1.bf16.msra.mxu0 %v3469_v2  ;;  %2296 = vmatpush1.bf16.msra.mxu1 %v3472_v3  ;;  %v3545_v2 = vld [vmem:[#allocation10 + $0x28] sm:$0xff]  }
 0x292   :  { %2215 = vmatprep.subr.bf16.mxu0 %v3477_v4  ;;  %2297 = vmatprep.subr.bf16.mxu1 %v3480_v5  ;;  %v3546_v3 = vld [vmem:[#allocation10 + $0xa8] sm:$0xff]   ;;  %v3547_v4 = vld [vmem:[#allocation10 + $0x70] sm:$0xff]  }
 0x293   :  { %v3548_v5 = vld [vmem:[#allocation10 + $0xf0] sm:$0xff]  }
 0x295   :  { %2216 = vmatpush1.bf16.msra.mxu0 %v3475_v40  ;;  %2298 = vmatpush1.bf16.msra.mxu1 %v3478_v6  ;;  %v3549_v40 = vld [vmem:[#allocation10 + $0x30] sm:$0xff]  }
 0x296   :  { %2217 = vmatprep.subr.bf16.mxu0 %v3483_v7  ;;  %2299 = vmatprep.subr.bf16.mxu1 %v3486_v8  ;;  %v3550_v6 = vld [vmem:[#allocation10 + $0xb0] sm:$0xff]   ;;  %v3551_v7 = vld [vmem:[#allocation10 + $0x78] sm:$0xff]  }
 0x297   :  { %v3552_v8 = vld [vmem:[#allocation10 + $0xf8] sm:$0xff]  }
 0x299   :  { %2218 = vmatpush1.bf16.msra.mxu0 %v3481_v9  ;;  %2300 = vmatpush1.bf16.msra.mxu1 %v3484_v0  ;;  %v3553_v9 = vld [vmem:[#allocation10 + $0x38] sm:$0xff]  }
 0x29a   :  { %2219 = vmatprep.subr.bf16.mxu0 %v3489_v10  ;;  %2301 = vmatprep.subr.bf16.mxu1 %v3492_v12  ;;  %v3554_v0 = vld [vmem:[#allocation10 + $0xb8] sm:$0xff]  }
 0x29b   :  { %v1496_v10 = vld [vmem:[%s3899_s6] sm:$0xf] }
 0x29c   :  { %v1501_v12 = vrot.slane %v1496_v10, %v3828_v39 }
 0x29d   :  { %2220 = vmatpush1.bf16.msra.mxu0 %v3487_v13  ;;  %2302 = vmatpush1.bf16.msra.mxu1 %v3490_v14  ;;  %v1509_v13 = vrot.slane %v1496_v10, %v3850_v54  ;;  %v1505_v14 = vrot.slane %v1496_v10, %v3836_v41 }
 0x29e   :  { %2221 = vmatprep.subr.bf16.mxu0 %v3495_v15  ;;  %2303 = vmatprep.subr.bf16.mxu1 %v3498_v17  ;;  %v1513_v15 = vrot.slane %v1496_v10, %v3843_v52 }
 0x2a1   :  { %2222 = vmatpush1.bf16.msra.mxu0 %v3493_v18  ;;  %2304 = vmatpush1.bf16.msra.mxu1 %v3496_v19 }
 0x2a2   :  { %2223 = vmatprep.subr.bf16.mxu0 %v3501_v20  ;;  %2305 = vmatprep.subr.bf16.mxu1 %v3504_v21 }
 0x2a5   :  { %2224 = vmatpush1.bf16.msra.mxu0 %v3499_v22  ;;  %2306 = vmatpush1.bf16.msra.mxu1 %v3502_v23 }
 0x2a6   :  { %2225 = vmatprep.subr.bf16.mxu0 %v3507_v24  ;;  %2307 = vmatprep.subr.bf16.mxu1 %v3510_v25 }
 0x2a9   :  { %2226 = vmatpush1.bf16.msra.mxu0 %v3505_v26  ;;  %2308 = vmatpush1.bf16.msra.mxu1 %v3508_v27 }
 0x2aa   :  { %2227 = vmatprep.subr.bf16.mxu0 %v3513_v29  ;;  %2309 = vmatprep.subr.bf16.mxu1 %v3516_v30 }
 0x2ad   :  { %2228 = vmatpush1.bf16.msra.mxu0 %v3511_v31  ;;  %2310 = vmatpush1.bf16.msra.mxu1 %v3514_v32 }
 0x2ae   :  { %2229 = vmatprep.subr.bf16.mxu0 %v3519_v34  ;;  %2311 = vmatprep.subr.bf16.mxu1 %v3522_v35  ;;  %v2979_v35 = vld [vmem:[%s3901_s8] ss:$0 sm:$0xff] }
 0x2b1   :  { %2230 = vmatpush1.bf16.msra.mxu0 %v3517_v36  ;;  %2312 = vmatpush1.bf16.msra.mxu1 %v3520_v37 }
 0x2b2   :  { %3012 = vmatprep.subr.bf16.mxu0 %v3523_v11  ;;  %3034 = vmatprep.subr.bf16.mxu1 %v3524_v43 }
 0x2b4   :  { %2232 = vmatmul.mubr.bf16.vlgmr.msra.gmra.mrb[8].mxu0 %v1366_v46  ;;  %2314 = vmatmul.mubr.bf16.vlgmr.msra.gmra.mrb[8].mxu1 %v1366_v46 }
 0x2b5   :  { %3013 = vmatpush3.bf16.msra.mxu0 %v3525_v44  ;;  %3035 = vmatpush3.bf16.msra.mxu1 %v3526_v45 }
 0x2b6   :  { %3014 = vmatprep.subr.bf16.mxu0 %v3527_v16  ;;  %3036 = vmatprep.subr.bf16.mxu1 %v3528_v47 }
 0x2b9   :  { %3015 = vmatpush3.bf16.msra.mxu0 %v3529_v48  ;;  %3037 = vmatpush3.bf16.msra.mxu1 %v3530_v49 }
 0x2ba   :  { %3016 = vmatprep.subr.bf16.mxu0 %v3531_v50  ;;  %3038 = vmatprep.subr.bf16.mxu1 %v3532_v51 }
 0x2bd   :  { %3017 = vmatpush3.bf16.msra.mxu0 %v3533_v53  ;;  %3039 = vmatpush3.bf16.msra.mxu1 %v3534_v55 }
 0x2be   :  { %3018 = vmatprep.subr.bf16.mxu0 %v3535_v56  ;;  %3040 = vmatprep.subr.bf16.mxu1 %v3536_v57 }
 0x2c1   :  { %3019 = vmatpush3.bf16.msra.mxu0 %v3537_v58  ;;  %3041 = vmatpush3.bf16.msra.mxu1 %v3538_v59 }
 0x2c2   :  { %3020 = vmatprep.subr.bf16.mxu0 %v3539_v60  ;;  %3042 = vmatprep.subr.bf16.mxu1 %v3540_v61 }
 0x2c5   :  { %3021 = vmatpush3.bf16.msra.mxu0 %v3541_v62  ;;  %3043 = vmatpush3.bf16.msra.mxu1 %v3542_v63 }
 0x2c6   :  { %3022 = vmatprep.subr.bf16.mxu0 %v3543_v38  ;;  %3044 = vmatprep.subr.bf16.mxu1 %v3544_v1 }
 0x2c9   :  { %3023 = vmatpush3.bf16.msra.mxu0 %v3545_v2  ;;  %3045 = vmatpush3.bf16.msra.mxu1 %v3546_v3 }
 0x2ca   :  { %3024 = vmatprep.subr.bf16.mxu0 %v3547_v4  ;;  %3046 = vmatprep.subr.bf16.mxu1 %v3548_v5 }
 0x2cd   :  { %3025 = vmatpush3.bf16.msra.mxu0 %v3549_v40  ;;  %3047 = vmatpush3.bf16.msra.mxu1 %v3550_v6 }
 0x2ce   :  { %3026 = vmatprep.subr.bf16.mxu0 %v3551_v7  ;;  %3048 = vmatprep.subr.bf16.mxu1 %v3552_v8 }
 0x2d1   :  { %3027 = vmatpush3.bf16.msra.mxu0 %v3553_v9  ;;  %3049 = vmatpush3.bf16.msra.mxu1 %v3554_v0 }
 0x387   :  { %v2233_v17 = vpop.f32.mrb[8].mxu0  ;;  %v2315_v18 = vpop.f32.mrb[8].mxu1 }
 0x388   :  { %v3060_v19 = vadd.f32 %v2233_v17, %v1501_v12  ;;  %v3062_v20 = vadd.f32 %v2315_v18, %v1509_v13  ;;  %v2235_v21 = vpop.f32.mrb[9].mxu0  ;;  %v2317_v22 = vpop.f32.mrb[9].mxu1 }
 0x389   :  { %v3061_v23 = vadd.f32 %v2235_v21, %v1505_v14  ;;  %v3063_v24 = vadd.f32 %v2317_v22, %v1513_v15  ;;  %v2237_v25 = vpop.f32.mrb[10].mxu0  ;;  %v2319_v26 = vpop.f32.mrb[10].mxu1 }
 0x38a   :  { %v2322_v27 = vmax.f32 %v3060_v19, 0.0  ;;  %v2324_v28 = vmax.f32 %v3062_v20, 0.0  ;;  %v2238_v29 = vpop.f32.mrb[11].mxu0  ;;  %v2320_v39 = vpop.f32.mrb[11].mxu1 }
 0x38b   :  { %v2323_v30 = vmax.f32 %v3061_v23, 0.0  ;;  %v2325_v54 = vmax.f32 %v3063_v24, 0.0 }
 0x38c   :  { %v2326_v32 = vpack.c.bf16 %v2322_v27, %v2322_v27  ;;  %v2328_v52 = vpack.c.bf16 %v2324_v28, %v2324_v28 }
 0x38d   :  { %v2327_v31 = vpack.c.bf16 %v2323_v30, %v2323_v30  ;;  %v2329_v41 = vpack.c.bf16 %v2325_v54, %v2325_v54 }
 0x38f   :  { %2625 = vmatprep.mubr.bf16.mxu0 %v2327_v31  ;;  %2665 = vmatprep.mubr.bf16.mxu1 %v2329_v41 }
 0x390   :  { %2626 = vmatmul.mubr.bf16.vlgmr.msra.gmra.mrb[12].mxu0 %v2326_v32  ;;  %2666 = vmatmul.mubr.bf16.vlgmr.msra.gmra.mrb[12].mxu1 %v2328_v52 }
 0x463   :  { %v3028_v33 = vpop.f32.mrb[12].mxu0  ;;  %v3050_v34 = vpop.f32.mrb[12].mxu1 }
 0x464   :  { %v3029_v36 = vpop.f32.mrb[13].mxu0  ;;  %v3051_v37 = vpop.f32.mrb[13].mxu1 }
 0x465   :  { %v3030_v42 = vadd.f32 %v3029_v36, %v3028_v33  ;;  %v3052_v11 = vadd.f32 %v3051_v37, %v3050_v34  ;;  %v3031_v43 = vpop.f32.mrb[14].mxu0  ;;  %v3053_v44 = vpop.f32.mrb[14].mxu1 }
 0x466   :  { %v3032_v45 = vpop.f32.mrb[15].mxu0  ;;  %v3054_v46 = vpop.f32.mrb[15].mxu1 }
 0x467   :  { %v2628_v16 = vadd.f32 %v3030_v42, %v2979_v35 }
 0x469   :  { %v2668_v47 = vadd.f32 %v3052_v11, %v2628_v16 }
 0x46b   :  { %2673 = vst [vmem:[#allocation11] sm:$0xff] %v2668_v47 }
 0x46c   :  { %3676 = shalt.err (!%p3673_p2)
}
 0x46d   :  { %s3677_s14 = scalar_lea.hbm %s3902_s9, 128 }
 0x46e   :  { %p3678_p3 = scmp.ne.s32.totalorder %s3902_s9, %s3677_s14  ;;  %p3681_p4 = scmp.lt.u32.totalorder %s3677_s14, %s3902_s9 }
 0x470   :  { %p3683_p5 = pnand %p3681_p4, %p3678_p3 }
 0x472   :  { %3686 = shalt.err (!%p3683_p5)
}
 0x473   :  { %2683 = dma.vmem_to_hbm [thread:$0]  %s2681_s13, 128, %s3902_s9, [#allocation4]  }
 0x474   :  { %3693 = dma.done.wait [#allocation4], 128  }
 0x475   :  { %3694 = vsyncadd [#allocation4], 4294967168 }
 0x476   :  { %2687 = vsyncpa [#allocation3], 1 }
 0x477   :  { %2688 = vsyncpa [#allocation6], 1 }
 0x478   :  { %2689 = vsyncpa [#allocation9], 1 }
 0x479   :  { %2690 = vsyncpa [#allocation4], 1 }

</bundles_post_ra>
